<compile_context>
chip_gen: v6e
topology: v6e:2x2x1
jax: 0.10.0
libtpu: 0.0.40
codegen_flags: <defaults>
</compile_context>

<pallas_src>
import math
from functools import partial

import jax
import jax.numpy as jnp
from jax.experimental import pallas as pl
from jax.experimental.pallas import tpu as pltpu


def attention_kernel(xq_ref, xkv_ref, wq_ref, bq_ref, wk_ref, bk_ref,
                     wv_ref, bv_ref, wd_ref, bd_ref, gamma_ref, beta_ref,
                     o_ref, kc_ref, vc_ref,
                     *, num_heads, head_dim, ln_eps):
    qi = pl.program_id(1)

    # --- K / V projections: compute once per batch element, cache in VMEM ---
    @pl.when(qi == 0)
    def _():
        xkv = xkv_ref[0].astype(jnp.bfloat16)                     # (S, H) bf16
        k = jnp.dot(xkv, wk_ref[...],
                    preferred_element_type=jnp.float32) + bk_ref[...]
        v = jnp.dot(xkv, wv_ref[...],
                    preferred_element_type=jnp.float32) + bv_ref[...]
        kc_ref[...] = k.astype(jnp.bfloat16)
        vc_ref[...] = v.astype(jnp.bfloat16)

    x = xq_ref[0].astype(jnp.float32)                             # (TQ, H) residual
    x_bf = x.astype(jnp.bfloat16)
    TQ, H = x.shape

    # --- Q projection (scale 1/sqrt(hd) already folded into wq/bq) ---
    q = jnp.dot(x_bf, wq_ref[...],
                preferred_element_type=jnp.float32) + bq_ref[...]
    q_bf = q.astype(jnp.bfloat16)                                 # (TQ, H)

    kc = kc_ref[...]                                              # (S, H) bf16
    vc = vc_ref[...]                                              # (S, H) bf16

    # --- per-head attention + head-major dense accumulation ---
    acc = jnp.zeros((TQ, H), jnp.float32)
    for h in range(num_heads):
        lo = h * head_dim
        hi = lo + head_dim
        q_h = q_bf[:, lo:hi]                                      # (TQ, hd) bf16
        k_h = kc[:, lo:hi]                                        # (S,  hd) bf16
        v_h = vc[:, lo:hi]                                        # (S,  hd) bf16

        # scores: contract head_dim (q_h . k_h^T) without an explicit .T array
        s = jax.lax.dot_general(
            q_h, k_h, (((1,), (1,)), ((), ())),
            preferred_element_type=jnp.float32)                   # (TQ, S) f32

        m = jnp.max(s, axis=-1, keepdims=True)
        p = jnp.exp(s - m)
        denom = jnp.sum(p, axis=-1, keepdims=True)

        ctx = jnp.dot(p.astype(jnp.bfloat16), v_h,
                      preferred_element_type=jnp.float32)         # (TQ, hd)
        # normalise after probs@V (flash-style); reciprocal goes to the EUP slot
        ctx = ctx * pl.reciprocal(denom, approx=True)

        # head-major slice of the dense weight: (hd, H) -> lane-dense output
        acc = acc + jnp.dot(ctx.astype(jnp.bfloat16), wd_ref[h],
                            preferred_element_type=jnp.float32)

    out = acc + bd_ref[...]

    # --- residual + LayerNorm (eps=1e-12, biased variance, PyTorch semantics) ---
    y = out + x
    mu = jnp.mean(y, axis=-1, keepdims=True)
    var = jnp.mean((y - mu) ** 2, axis=-1, keepdims=True)
    y_norm = (y - mu) * jax.lax.rsqrt(var + ln_eps)
    o_ref[0] = (y_norm * gamma_ref[...] + beta_ref[...]).astype(o_ref.dtype)


def _pick_q_tile(S, max_tile=256):
    if S <= max_tile:
        return S
    for t in range(max_tile, 0, -1):
        if S % t == 0:
            return t
    return S


def attention_layer(hidden_states, params, *, num_heads):
    """hidden_states: (B, S, H) float32.  params: dict of f32 weights (see init)."""
    B, S, H = hidden_states.shape
    assert H % num_heads == 0
    head_dim = H // num_heads
    tq = _pick_q_tile(S)
    n_q_tiles = S // tq

    # ---- one-time wrapper-side weight prep (bf16 MXU feeds, head-major wd) ----
    scale = 1.0 / math.sqrt(head_dim)
    wq = (params["wq"] * scale).astype(jnp.bfloat16)      # fold 1/sqrt(hd) into Q
    bq = params["bq"] * scale
    wk = params["wk"].astype(jnp.bfloat16)
    wv = params["wv"].astype(jnp.bfloat16)
    wd = params["wd"].reshape(num_heads, head_dim, H).astype(jnp.bfloat16)

    kernel = partial(attention_kernel, num_heads=num_heads,
                     head_dim=head_dim, ln_eps=1e-12)

    w_full = pl.BlockSpec((H, H), lambda b, qi: (0, 0))
    wd_full = pl.BlockSpec((num_heads, head_dim, H), lambda b, qi: (0, 0, 0))
    vec = pl.BlockSpec((1, H), lambda b, qi: (0, 0))

    # rough VMEM budget (kept below v7x's 64 MiB per-TC capacity)
    est = (2 * (3 * H * H + num_heads * head_dim * H) * 2      # bf16 weights (2x buf)
           + 2 * (tq + S + tq) * H * 4                          # x_q, x_kv, out (f32, 2x)
           + 2 * S * H * 2                                      # k/v caches (bf16)
           + 8 * tq * max(S, H) * 4)                            # f32 intermediates headroom
    vmem_limit = int(min(max(2 * est, 32 * 1024 * 1024), 60 * 1024 * 1024))

    return pl.pallas_call(
        kernel,
        out_shape=jax.ShapeDtypeStruct((B, S, H), hidden_states.dtype),
        grid_spec=pltpu.PrefetchScalarGridSpec(
            num_scalar_prefetch=0,
            grid=(B, n_q_tiles),
            in_specs=[
                pl.BlockSpec((1, tq, H), lambda b, qi: (b, qi, 0)),  # query tile
                pl.BlockSpec((1, S, H), lambda b, qi: (b, 0, 0)),    # full seq for K/V
                w_full, vec,                                          # query proj
                w_full, vec,                                          # key proj
                w_full, vec,                                          # value proj
                wd_full, vec,                                         # dense (head-major)
                vec, vec,                                             # LN gamma / beta
            ],
            out_specs=pl.BlockSpec((1, tq, H), lambda b, qi: (b, qi, 0)),
            scratch_shapes=[
                pltpu.VMEM((S, H), jnp.bfloat16),                    # K cache
                pltpu.VMEM((S, H), jnp.bfloat16),                    # V cache
            ],
        ),
        compiler_params=pltpu.CompilerParams(
            dimension_semantics=("parallel", "arbitrary"),
            vmem_limit_bytes=vmem_limit),
    )(hidden_states, hidden_states,
      wq, bq, wk, params["bk"], wv, params["bv"],
      wd, params["bd"], params["ln_gamma"], params["ln_beta"])


def init_params(key, hidden_size):
    """Deterministic Xavier-uniform init matching the PyTorch module.

    Weights are stored as (in_features, out_features) so the layer computes x @ W.
    """
    H = hidden_size
    bound = math.sqrt(6.0 / (H + H))  # xavier uniform, fan_in = fan_out = H
    ks = jax.random.split(key, 4)
    params = {
        "wq": jax.random.uniform(ks[0], (H, H), jnp.float32, -bound, bound),
        "wk": jax.random.uniform(ks[1], (H, H), jnp.float32, -bound, bound),
        "wv": jax.random.uniform(ks[2], (H, H), jnp.float32, -bound, bound),
        "wd": jax.random.uniform(ks[3], (H, H), jnp.float32, -bound, bound),
        "bq": jnp.zeros((1, H), jnp.float32),
        "bk": jnp.zeros((1, H), jnp.float32),
        "bv": jnp.zeros((1, H), jnp.float32),
        "bd": jnp.zeros((1, H), jnp.float32),
        "ln_gamma": jnp.ones((1, H), jnp.float32),
        "ln_beta": jnp.zeros((1, H), jnp.float32),
    }
    return params


def attention_layer_ref(hidden_states, params, *, num_heads):
    """Pure-JAX f32 reference (mirrors the PyTorch forward, dropout=eval)."""
    B, S, H = hidden_states.shape
    hd = H // num_heads
    x = hidden_states
    q = x @ params["wq"] + params["bq"]
    k = x @ params["wk"] + params["bk"]
    v = x @ params["wv"] + params["bv"]

    def split(t):
        return t.reshape(B, S, num_heads, hd).transpose(0, 2, 1, 3)

    qh, kh, vh = split(q), split(k), split(v)
    scores = jnp.einsum('bhqd,bhkd->bhqk', qh, kh) / math.sqrt(hd)
    probs = jax.nn.softmax(scores, axis=-1)
    ctx = jnp.einsum('bhqk,bhkd->bhqd', probs, vh)
    ctx = ctx.transpose(0, 2, 1, 3).reshape(B, S, H)
    out = ctx @ params["wd"] + params["bd"]
    y = out + x
    mu = y.mean(-1, keepdims=True)
    var = ((y - mu) ** 2).mean(-1, keepdims=True)
    yn = (y - mu) / jnp.sqrt(var + 1e-12)
    return yn * params["ln_gamma"] + params["ln_beta"]


if __name__ == "__main__":
    B, S, H = 2, 8, 32
    NUM_HEADS = 8

    key = jax.random.PRNGKey(0)
    k_x, k_p = jax.random.split(key)
    hidden_states = jax.random.normal(k_x, (B, S, H), jnp.float32)
    params = init_params(k_p, H)

    out = attention_layer(hidden_states, params, num_heads=NUM_HEADS)
    out = jax.block_until_ready(out)

    ref = attention_layer_ref(hidden_states, params, num_heads=NUM_HEADS)
    assert out.shape == (B, S, H)
    # bf16 MXU feeds + approx reciprocal -> loosened tolerance vs the f32 reference.
    assert jnp.allclose(out, ref, atol=3e-2, rtol=3e-2), \
        f"mismatch: max abs err {jnp.max(jnp.abs(out - ref))}"

    print("KERNEL_OK")
</pallas_src>

<mosaic_0001>
module attributes {stable_mosaic.version = 11 : i64} {
  func.func @attention_kernel(%arg0: i32, %arg1: i32, %arg2: memref<1x8x32xf32, #tpu.memory_space<vmem>>, %arg3: memref<1x8x32xf32, #tpu.memory_space<vmem>>, %arg4: memref<32x32xbf16, #tpu.memory_space<vmem>>, %arg5: memref<1x32xf32, #tpu.memory_space<vmem>>, %arg6: memref<32x32xbf16, #tpu.memory_space<vmem>>, %arg7: memref<1x32xf32, #tpu.memory_space<vmem>>, %arg8: memref<32x32xbf16, #tpu.memory_space<vmem>>, %arg9: memref<1x32xf32, #tpu.memory_space<vmem>>, %arg10: memref<8x4x32xbf16, #tpu.memory_space<vmem>>, %arg11: memref<1x32xf32, #tpu.memory_space<vmem>>, %arg12: memref<1x32xf32, #tpu.memory_space<vmem>>, %arg13: memref<1x32xf32, #tpu.memory_space<vmem>>, %arg14: memref<1x8x32xf32, #tpu.memory_space<vmem>>, %arg15: memref<8x32xbf16, #tpu.memory_space<vmem>>, %arg16: memref<8x32xbf16, #tpu.memory_space<vmem>>) attributes {dimension_semantics = [#tpu.dimension_semantics<parallel>, #tpu.dimension_semantics<arbitrary>], iteration_bounds = array<i64: 2, 1>, scalar_prefetch = 0 : i64, scratch_operands = 2 : i64, tpu.core_type = #tpu.core_type<tc>, window_params = [{transform_indices = @transform_0, window_bounds = array<i64: 1, 8, 32>}, {transform_indices = @transform_1, window_bounds = array<i64: 1, 8, 32>}, {pipeline_mode = #tpu.pipeline_mode<synchronous>, transform_indices = @transform_2, window_bounds = array<i64: 32, 32>}, {pipeline_mode = #tpu.pipeline_mode<synchronous>, transform_indices = @transform_3, window_bounds = array<i64: 1, 32>}, {pipeline_mode = #tpu.pipeline_mode<synchronous>, transform_indices = @transform_4, window_bounds = array<i64: 32, 32>}, {pipeline_mode = #tpu.pipeline_mode<synchronous>, transform_indices = @transform_5, window_bounds = array<i64: 1, 32>}, {pipeline_mode = #tpu.pipeline_mode<synchronous>, transform_indices = @transform_6, window_bounds = array<i64: 32, 32>}, {pipeline_mode = #tpu.pipeline_mode<synchronous>, transform_indices = @transform_7, window_bounds = array<i64: 1, 32>}, {pipeline_mode = #tpu.pipeline_mode<synchronous>, transform_indices = @transform_8, window_bounds = array<i64: 8, 4, 32>}, {pipeline_mode = #tpu.pipeline_mode<synchronous>, transform_indices = @transform_9, window_bounds = array<i64: 1, 32>}, {pipeline_mode = #tpu.pipeline_mode<synchronous>, transform_indices = @transform_10, window_bounds = array<i64: 1, 32>}, {pipeline_mode = #tpu.pipeline_mode<synchronous>, transform_indices = @transform_11, window_bounds = array<i64: 1, 32>}, {transform_indices = @transform_12, window_bounds = array<i64: 1, 8, 32>}]} {
    %c0_i32 = arith.constant 0 : i32
    %0 = arith.cmpi eq, %arg1, %c0_i32 : i32
    %1 = arith.extui %0 : i1 to i32
    %c0_i32_0 = arith.constant 0 : i32
    %2 = arith.cmpi ne, %1, %c0_i32_0 : i32
    scf.if %2 {
      %c0_83 = arith.constant 0 : index
      %c0_84 = arith.constant 0 : index
      %c0_85 = arith.constant 0 : index
      %214 = vector.load %arg3[%c0_83, %c0_84, %c0_85] : memref<1x8x32xf32, #tpu.memory_space<vmem>>, vector<1x8x32xf32>
      %215 = vector.shape_cast %214 : vector<1x8x32xf32> to vector<8x32xf32>
      %216 = arith.truncf %215 : vector<8x32xf32> to vector<8x32xbf16>
      %c0_86 = arith.constant 0 : index
      %c0_87 = arith.constant 0 : index
      %217 = vector.load %arg6[%c0_86, %c0_87] : memref<32x32xbf16, #tpu.memory_space<vmem>>, vector<32x32xbf16>
      %cst_88 = arith.constant dense<0.000000e+00> : vector<8x32xf32>
      %218 = tpu.matmul %216, %217, %cst_88 {dimension_numbers = #tpu.dot_dimension_numbers<[1], [0], [0], [1], [0, 0, 1, 1], [], []>} : vector<8x32xbf16>, vector<32x32xbf16>, vector<8x32xf32> -> vector<8x32xf32>
      %c0_89 = arith.constant 0 : index
      %c0_90 = arith.constant 0 : index
      %219 = vector.load %arg7[%c0_89, %c0_90] : memref<1x32xf32, #tpu.memory_space<vmem>>, vector<1x32xf32>
      %220 = vector.broadcast %219 : vector<1x32xf32> to vector<8x32xf32>
      %221 = arith.addf %218, %220 : vector<8x32xf32>
      %c0_91 = arith.constant 0 : index
      %c0_92 = arith.constant 0 : index
      %222 = vector.load %arg8[%c0_91, %c0_92] : memref<32x32xbf16, #tpu.memory_space<vmem>>, vector<32x32xbf16>
      %cst_93 = arith.constant dense<0.000000e+00> : vector<8x32xf32>
      %223 = tpu.matmul %216, %222, %cst_93 {dimension_numbers = #tpu.dot_dimension_numbers<[1], [0], [0], [1], [0, 0, 1, 1], [], []>} : vector<8x32xbf16>, vector<32x32xbf16>, vector<8x32xf32> -> vector<8x32xf32>
      %c0_94 = arith.constant 0 : index
      %c0_95 = arith.constant 0 : index
      %224 = vector.load %arg9[%c0_94, %c0_95] : memref<1x32xf32, #tpu.memory_space<vmem>>, vector<1x32xf32>
      %225 = vector.broadcast %224 : vector<1x32xf32> to vector<8x32xf32>
      %226 = arith.addf %223, %225 : vector<8x32xf32>
      %227 = arith.truncf %221 : vector<8x32xf32> to vector<8x32xbf16>
      %c0_96 = arith.constant 0 : index
      %c0_97 = arith.constant 0 : index
      %228 = vector.load %arg15[%c0_96, %c0_97] : memref<8x32xbf16, #tpu.memory_space<vmem>>, vector<8x32xbf16>
      tpu.vector_store %arg15[%c0_96, %c0_97], %227 {strides = array<i32>} : memref<8x32xbf16, #tpu.memory_space<vmem>>, vector<8x32xbf16>,
      %229 = arith.truncf %226 : vector<8x32xf32> to vector<8x32xbf16>
      %c0_98 = arith.constant 0 : index
      %c0_99 = arith.constant 0 : index
      %230 = vector.load %arg16[%c0_98, %c0_99] : memref<8x32xbf16, #tpu.memory_space<vmem>>, vector<8x32xbf16>
      tpu.vector_store %arg16[%c0_98, %c0_99], %229 {strides = array<i32>} : memref<8x32xbf16, #tpu.memory_space<vmem>>, vector<8x32xbf16>,
    } else {
    }
    %c0 = arith.constant 0 : index
    %c0_1 = arith.constant 0 : index
    %c0_2 = arith.constant 0 : index
    %3 = vector.load %arg2[%c0, %c0_1, %c0_2] : memref<1x8x32xf32, #tpu.memory_space<vmem>>, vector<1x8x32xf32>
    %4 = vector.shape_cast %3 : vector<1x8x32xf32> to vector<8x32xf32>
    %5 = arith.truncf %4 : vector<8x32xf32> to vector<8x32xbf16>
    %c0_3 = arith.constant 0 : index
    %c0_4 = arith.constant 0 : index
    %6 = vector.load %arg4[%c0_3, %c0_4] : memref<32x32xbf16, #tpu.memory_space<vmem>>, vector<32x32xbf16>
    %cst = arith.constant dense<0.000000e+00> : vector<8x32xf32>
    %7 = tpu.matmul %5, %6, %cst {dimension_numbers = #tpu.dot_dimension_numbers<[1], [0], [0], [1], [0, 0, 1, 1], [], []>} : vector<8x32xbf16>, vector<32x32xbf16>, vector<8x32xf32> -> vector<8x32xf32>
    %c0_5 = arith.constant 0 : index
    %c0_6 = arith.constant 0 : index
    %8 = vector.load %arg5[%c0_5, %c0_6] : memref<1x32xf32, #tpu.memory_space<vmem>>, vector<1x32xf32>
    %9 = vector.broadcast %8 : vector<1x32xf32> to vector<8x32xf32>
    %10 = arith.addf %7, %9 : vector<8x32xf32>
    %11 = arith.truncf %10 : vector<8x32xf32> to vector<8x32xbf16>
    %c0_7 = arith.constant 0 : index
    %c0_8 = arith.constant 0 : index
    %12 = vector.load %arg15[%c0_7, %c0_8] : memref<8x32xbf16, #tpu.memory_space<vmem>>, vector<8x32xbf16>
    %c0_9 = arith.constant 0 : index
    %c0_10 = arith.constant 0 : index
    %13 = vector.load %arg16[%c0_9, %c0_10] : memref<8x32xbf16, #tpu.memory_space<vmem>>, vector<8x32xbf16>
    %cst_11 = arith.constant 0.000000e+00 : f32
    %14 = vector.broadcast %cst_11 : f32 to vector<8x32xf32>
    %15 = vector.extract_strided_slice %11 {offsets = [0, 0], sizes = [8, 4], strides = [1, 1]} : vector<8x32xbf16> to vector<8x4xbf16>
    %16 = vector.extract_strided_slice %12 {offsets = [0, 0], sizes = [8, 4], strides = [1, 1]} : vector<8x32xbf16> to vector<8x4xbf16>
    %17 = vector.extract_strided_slice %13 {offsets = [0, 0], sizes = [8, 4], strides = [1, 1]} : vector<8x32xbf16> to vector<8x4xbf16>
    %cst_12 = arith.constant dense<0.000000e+00> : vector<8x8xf32>
    %18 = tpu.matmul %15, %16, %cst_12 {dimension_numbers = #tpu.dot_dimension_numbers<[1], [1], [0], [0], [0, 0, 1, 0], [], []>} : vector<8x4xbf16>, vector<8x4xbf16>, vector<8x8xf32> -> vector<8x8xf32>
    %cst_13 = arith.constant dense<0xFF800000> : vector<8xf32>
    %19 = vector.multi_reduction <maximumf>, %18, %cst_13 [1] : vector<8x8xf32> to vector<8xf32>
    %20 = vector.shape_cast %19 : vector<8xf32> to vector<8x1xf32>
    %21 = vector.broadcast %20 : vector<8x1xf32> to vector<8x8xf32>
    %22 = arith.subf %18, %21 : vector<8x8xf32>
    %23 = math.exp %22 : vector<8x8xf32>
    %cst_14 = arith.constant dense<0.000000e+00> : vector<8xf32>
    %24 = vector.multi_reduction <add>, %23, %cst_14 [1] : vector<8x8xf32> to vector<8xf32>
    %25 = vector.shape_cast %24 : vector<8xf32> to vector<8x1xf32>
    %26 = arith.truncf %23 : vector<8x8xf32> to vector<8x8xbf16>
    %cst_15 = arith.constant dense<0.000000e+00> : vector<8x4xf32>
    %27 = tpu.matmul %26, %17, %cst_15 {dimension_numbers = #tpu.dot_dimension_numbers<[1], [0], [0], [1], [0, 0, 1, 1], [], []>} : vector<8x8xbf16>, vector<8x4xbf16>, vector<8x4xf32> -> vector<8x4xf32>
    %28 = tpu.reciprocal %25 {approx = true} : vector<8x1xf32> -> vector<8x1xf32>
    %29 = vector.broadcast %28 : vector<8x1xf32> to vector<8x4xf32>
    %30 = arith.mulf %27, %29 : vector<8x4xf32>
    %31 = arith.truncf %30 : vector<8x4xf32> to vector<8x4xbf16>
    %c0_16 = arith.constant 0 : index
    %c0_17 = arith.constant 0 : index
    %c0_18 = arith.constant 0 : index
    %32 = vector.load %arg10[%c0_16, %c0_17, %c0_18] : memref<8x4x32xbf16, #tpu.memory_space<vmem>>, vector<1x4x32xbf16>
    %33 = vector.shape_cast %32 : vector<1x4x32xbf16> to vector<4x32xbf16>
    %cst_19 = arith.constant dense<0.000000e+00> : vector<8x32xf32>
    %34 = tpu.matmul %31, %33, %cst_19 {dimension_numbers = #tpu.dot_dimension_numbers<[1], [0], [0], [1], [0, 0, 1, 1], [], []>} : vector<8x4xbf16>, vector<4x32xbf16>, vector<8x32xf32> -> vector<8x32xf32>
    %35 = arith.addf %14, %34 : vector<8x32xf32>
    %36 = vector.extract_strided_slice %11 {offsets = [0, 4], sizes = [8, 4], strides = [1, 1]} : vector<8x32xbf16> to vector<8x4xbf16>
    %37 = vector.extract_strided_slice %12 {offsets = [0, 4], sizes = [8, 4], strides = [1, 1]} : vector<8x32xbf16> to vector<8x4xbf16>
    %38 = vector.extract_strided_slice %13 {offsets = [0, 4], sizes = [8, 4], strides = [1, 1]} : vector<8x32xbf16> to vector<8x4xbf16>
    %cst_20 = arith.constant dense<0.000000e+00> : vector<8x8xf32>
    %39 = tpu.matmul %36, %37, %cst_20 {dimension_numbers = #tpu.dot_dimension_numbers<[1], [1], [0], [0], [0, 0, 1, 0], [], []>} : vector<8x4xbf16>, vector<8x4xbf16>, vector<8x8xf32> -> vector<8x8xf32>
    %cst_21 = arith.constant dense<0xFF800000> : vector<8xf32>
    %40 = vector.multi_reduction <maximumf>, %39, %cst_21 [1] : vector<8x8xf32> to vector<8xf32>
    %41 = vector.shape_cast %40 : vector<8xf32> to vector<8x1xf32>
    %42 = vector.broadcast %41 : vector<8x1xf32> to vector<8x8xf32>
    %43 = arith.subf %39, %42 : vector<8x8xf32>
    %44 = math.exp %43 : vector<8x8xf32>
    %cst_22 = arith.constant dense<0.000000e+00> : vector<8xf32>
    %45 = vector.multi_reduction <add>, %44, %cst_22 [1] : vector<8x8xf32> to vector<8xf32>
    %46 = vector.shape_cast %45 : vector<8xf32> to vector<8x1xf32>
    %47 = arith.truncf %44 : vector<8x8xf32> to vector<8x8xbf16>
    %cst_23 = arith.constant dense<0.000000e+00> : vector<8x4xf32>
    %48 = tpu.matmul %47, %38, %cst_23 {dimension_numbers = #tpu.dot_dimension_numbers<[1], [0], [0], [1], [0, 0, 1, 1], [], []>} : vector<8x8xbf16>, vector<8x4xbf16>, vector<8x4xf32> -> vector<8x4xf32>
    %49 = tpu.reciprocal %46 {approx = true} : vector<8x1xf32> -> vector<8x1xf32>
    %50 = vector.broadcast %49 : vector<8x1xf32> to vector<8x4xf32>
    %51 = arith.mulf %48, %50 : vector<8x4xf32>
    %52 = arith.truncf %51 : vector<8x4xf32> to vector<8x4xbf16>
    %c1 = arith.constant 1 : index
    %c0_24 = arith.constant 0 : index
    %c0_25 = arith.constant 0 : index
    %53 = vector.load %arg10[%c1, %c0_24, %c0_25] : memref<8x4x32xbf16, #tpu.memory_space<vmem>>, vector<1x4x32xbf16>
    %54 = vector.shape_cast %53 : vector<1x4x32xbf16> to vector<4x32xbf16>
    %cst_26 = arith.constant dense<0.000000e+00> : vector<8x32xf32>
    %55 = tpu.matmul %52, %54, %cst_26 {dimension_numbers = #tpu.dot_dimension_numbers<[1], [0], [0], [1], [0, 0, 1, 1], [], []>} : vector<8x4xbf16>, vector<4x32xbf16>, vector<8x32xf32> -> vector<8x32xf32>
    %56 = arith.addf %35, %55 : vector<8x32xf32>
    %57 = vector.extract_strided_slice %11 {offsets = [0, 8], sizes = [8, 4], strides = [1, 1]} : vector<8x32xbf16> to vector<8x4xbf16>
    %58 = vector.extract_strided_slice %12 {offsets = [0, 8], sizes = [8, 4], strides = [1, 1]} : vector<8x32xbf16> to vector<8x4xbf16>
    %59 = vector.extract_strided_slice %13 {offsets = [0, 8], sizes = [8, 4], strides = [1, 1]} : vector<8x32xbf16> to vector<8x4xbf16>
    %cst_27 = arith.constant dense<0.000000e+00> : vector<8x8xf32>
    %60 = tpu.matmul %57, %58, %cst_27 {dimension_numbers = #tpu.dot_dimension_numbers<[1], [1], [0], [0], [0, 0, 1, 0], [], []>} : vector<8x4xbf16>, vector<8x4xbf16>, vector<8x8xf32> -> vector<8x8xf32>
    %cst_28 = arith.constant dense<0xFF800000> : vector<8xf32>
    %61 = vector.multi_reduction <maximumf>, %60, %cst_28 [1] : vector<8x8xf32> to vector<8xf32>
    %62 = vector.shape_cast %61 : vector<8xf32> to vector<8x1xf32>
    %63 = vector.broadcast %62 : vector<8x1xf32> to vector<8x8xf32>
    %64 = arith.subf %60, %63 : vector<8x8xf32>
    %65 = math.exp %64 : vector<8x8xf32>
    %cst_29 = arith.constant dense<0.000000e+00> : vector<8xf32>
    %66 = vector.multi_reduction <add>, %65, %cst_29 [1] : vector<8x8xf32> to vector<8xf32>
    %67 = vector.shape_cast %66 : vector<8xf32> to vector<8x1xf32>
    %68 = arith.truncf %65 : vector<8x8xf32> to vector<8x8xbf16>
    %cst_30 = arith.constant dense<0.000000e+00> : vector<8x4xf32>
    %69 = tpu.matmul %68, %59, %cst_30 {dimension_numbers = #tpu.dot_dimension_numbers<[1], [0], [0], [1], [0, 0, 1, 1], [], []>} : vector<8x8xbf16>, vector<8x4xbf16>, vector<8x4xf32> -> vector<8x4xf32>
    %70 = tpu.reciprocal %67 {approx = true} : vector<8x1xf32> -> vector<8x1xf32>
    %71 = vector.broadcast %70 : vector<8x1xf32> to vector<8x4xf32>
    %72 = arith.mulf %69, %71 : vector<8x4xf32>
    %73 = arith.truncf %72 : vector<8x4xf32> to vector<8x4xbf16>
    %c2 = arith.constant 2 : index
    %c0_31 = arith.constant 0 : index
    %c0_32 = arith.constant 0 : index
    %74 = vector.load %arg10[%c2, %c0_31, %c0_32] : memref<8x4x32xbf16, #tpu.memory_space<vmem>>, vector<1x4x32xbf16>
    %75 = vector.shape_cast %74 : vector<1x4x32xbf16> to vector<4x32xbf16>
    %cst_33 = arith.constant dense<0.000000e+00> : vector<8x32xf32>
    %76 = tpu.matmul %73, %75, %cst_33 {dimension_numbers = #tpu.dot_dimension_numbers<[1], [0], [0], [1], [0, 0, 1, 1], [], []>} : vector<8x4xbf16>, vector<4x32xbf16>, vector<8x32xf32> -> vector<8x32xf32>
    %77 = arith.addf %56, %76 : vector<8x32xf32>
    %78 = vector.extract_strided_slice %11 {offsets = [0, 12], sizes = [8, 4], strides = [1, 1]} : vector<8x32xbf16> to vector<8x4xbf16>
    %79 = vector.extract_strided_slice %12 {offsets = [0, 12], sizes = [8, 4], strides = [1, 1]} : vector<8x32xbf16> to vector<8x4xbf16>
    %80 = vector.extract_strided_slice %13 {offsets = [0, 12], sizes = [8, 4], strides = [1, 1]} : vector<8x32xbf16> to vector<8x4xbf16>
    %cst_34 = arith.constant dense<0.000000e+00> : vector<8x8xf32>
    %81 = tpu.matmul %78, %79, %cst_34 {dimension_numbers = #tpu.dot_dimension_numbers<[1], [1], [0], [0], [0, 0, 1, 0], [], []>} : vector<8x4xbf16>, vector<8x4xbf16>, vector<8x8xf32> -> vector<8x8xf32>
    %cst_35 = arith.constant dense<0xFF800000> : vector<8xf32>
    %82 = vector.multi_reduction <maximumf>, %81, %cst_35 [1] : vector<8x8xf32> to vector<8xf32>
    %83 = vector.shape_cast %82 : vector<8xf32> to vector<8x1xf32>
    %84 = vector.broadcast %83 : vector<8x1xf32> to vector<8x8xf32>
    %85 = arith.subf %81, %84 : vector<8x8xf32>
    %86 = math.exp %85 : vector<8x8xf32>
    %cst_36 = arith.constant dense<0.000000e+00> : vector<8xf32>
    %87 = vector.multi_reduction <add>, %86, %cst_36 [1] : vector<8x8xf32> to vector<8xf32>
    %88 = vector.shape_cast %87 : vector<8xf32> to vector<8x1xf32>
    %89 = arith.truncf %86 : vector<8x8xf32> to vector<8x8xbf16>
    %cst_37 = arith.constant dense<0.000000e+00> : vector<8x4xf32>
    %90 = tpu.matmul %89, %80, %cst_37 {dimension_numbers = #tpu.dot_dimension_numbers<[1], [0], [0], [1], [0, 0, 1, 1], [], []>} : vector<8x8xbf16>, vector<8x4xbf16>, vector<8x4xf32> -> vector<8x4xf32>
    %91 = tpu.reciprocal %88 {approx = true} : vector<8x1xf32> -> vector<8x1xf32>
    %92 = vector.broadcast %91 : vector<8x1xf32> to vector<8x4xf32>
    %93 = arith.mulf %90, %92 : vector<8x4xf32>
    %94 = arith.truncf %93 : vector<8x4xf32> to vector<8x4xbf16>
    %c3 = arith.constant 3 : index
    %c0_38 = arith.constant 0 : index
    %c0_39 = arith.constant 0 : index
    %95 = vector.load %arg10[%c3, %c0_38, %c0_39] : memref<8x4x32xbf16, #tpu.memory_space<vmem>>, vector<1x4x32xbf16>
    %96 = vector.shape_cast %95 : vector<1x4x32xbf16> to vector<4x32xbf16>
    %cst_40 = arith.constant dense<0.000000e+00> : vector<8x32xf32>
    %97 = tpu.matmul %94, %96, %cst_40 {dimension_numbers = #tpu.dot_dimension_numbers<[1], [0], [0], [1], [0, 0, 1, 1], [], []>} : vector<8x4xbf16>, vector<4x32xbf16>, vector<8x32xf32> -> vector<8x32xf32>
    %98 = arith.addf %77, %97 : vector<8x32xf32>
    %99 = vector.extract_strided_slice %11 {offsets = [0, 16], sizes = [8, 4], strides = [1, 1]} : vector<8x32xbf16> to vector<8x4xbf16>
    %100 = vector.extract_strided_slice %12 {offsets = [0, 16], sizes = [8, 4], strides = [1, 1]} : vector<8x32xbf16> to vector<8x4xbf16>
    %101 = vector.extract_strided_slice %13 {offsets = [0, 16], sizes = [8, 4], strides = [1, 1]} : vector<8x32xbf16> to vector<8x4xbf16>
    %cst_41 = arith.constant dense<0.000000e+00> : vector<8x8xf32>
    %102 = tpu.matmul %99, %100, %cst_41 {dimension_numbers = #tpu.dot_dimension_numbers<[1], [1], [0], [0], [0, 0, 1, 0], [], []>} : vector<8x4xbf16>, vector<8x4xbf16>, vector<8x8xf32> -> vector<8x8xf32>
    %cst_42 = arith.constant dense<0xFF800000> : vector<8xf32>
    %103 = vector.multi_reduction <maximumf>, %102, %cst_42 [1] : vector<8x8xf32> to vector<8xf32>
    %104 = vector.shape_cast %103 : vector<8xf32> to vector<8x1xf32>
    %105 = vector.broadcast %104 : vector<8x1xf32> to vector<8x8xf32>
    %106 = arith.subf %102, %105 : vector<8x8xf32>
    %107 = math.exp %106 : vector<8x8xf32>
    %cst_43 = arith.constant dense<0.000000e+00> : vector<8xf32>
    %108 = vector.multi_reduction <add>, %107, %cst_43 [1] : vector<8x8xf32> to vector<8xf32>
    %109 = vector.shape_cast %108 : vector<8xf32> to vector<8x1xf32>
    %110 = arith.truncf %107 : vector<8x8xf32> to vector<8x8xbf16>
    %cst_44 = arith.constant dense<0.000000e+00> : vector<8x4xf32>
    %111 = tpu.matmul %110, %101, %cst_44 {dimension_numbers = #tpu.dot_dimension_numbers<[1], [0], [0], [1], [0, 0, 1, 1], [], []>} : vector<8x8xbf16>, vector<8x4xbf16>, vector<8x4xf32> -> vector<8x4xf32>
    %112 = tpu.reciprocal %109 {approx = true} : vector<8x1xf32> -> vector<8x1xf32>
    %113 = vector.broadcast %112 : vector<8x1xf32> to vector<8x4xf32>
    %114 = arith.mulf %111, %113 : vector<8x4xf32>
    %115 = arith.truncf %114 : vector<8x4xf32> to vector<8x4xbf16>
    %c4 = arith.constant 4 : index
    %c0_45 = arith.constant 0 : index
    %c0_46 = arith.constant 0 : index
    %116 = vector.load %arg10[%c4, %c0_45, %c0_46] : memref<8x4x32xbf16, #tpu.memory_space<vmem>>, vector<1x4x32xbf16>
    %117 = vector.shape_cast %116 : vector<1x4x32xbf16> to vector<4x32xbf16>
    %cst_47 = arith.constant dense<0.000000e+00> : vector<8x32xf32>
    %118 = tpu.matmul %115, %117, %cst_47 {dimension_numbers = #tpu.dot_dimension_numbers<[1], [0], [0], [1], [0, 0, 1, 1], [], []>} : vector<8x4xbf16>, vector<4x32xbf16>, vector<8x32xf32> -> vector<8x32xf32>
    %119 = arith.addf %98, %118 : vector<8x32xf32>
    %120 = vector.extract_strided_slice %11 {offsets = [0, 20], sizes = [8, 4], strides = [1, 1]} : vector<8x32xbf16> to vector<8x4xbf16>
    %121 = vector.extract_strided_slice %12 {offsets = [0, 20], sizes = [8, 4], strides = [1, 1]} : vector<8x32xbf16> to vector<8x4xbf16>
    %122 = vector.extract_strided_slice %13 {offsets = [0, 20], sizes = [8, 4], strides = [1, 1]} : vector<8x32xbf16> to vector<8x4xbf16>
    %cst_48 = arith.constant dense<0.000000e+00> : vector<8x8xf32>
    %123 = tpu.matmul %120, %121, %cst_48 {dimension_numbers = #tpu.dot_dimension_numbers<[1], [1], [0], [0], [0, 0, 1, 0], [], []>} : vector<8x4xbf16>, vector<8x4xbf16>, vector<8x8xf32> -> vector<8x8xf32>
    %cst_49 = arith.constant dense<0xFF800000> : vector<8xf32>
    %124 = vector.multi_reduction <maximumf>, %123, %cst_49 [1] : vector<8x8xf32> to vector<8xf32>
    %125 = vector.shape_cast %124 : vector<8xf32> to vector<8x1xf32>
    %126 = vector.broadcast %125 : vector<8x1xf32> to vector<8x8xf32>
    %127 = arith.subf %123, %126 : vector<8x8xf32>
    %128 = math.exp %127 : vector<8x8xf32>
    %cst_50 = arith.constant dense<0.000000e+00> : vector<8xf32>
    %129 = vector.multi_reduction <add>, %128, %cst_50 [1] : vector<8x8xf32> to vector<8xf32>
    %130 = vector.shape_cast %129 : vector<8xf32> to vector<8x1xf32>
    %131 = arith.truncf %128 : vector<8x8xf32> to vector<8x8xbf16>
    %cst_51 = arith.constant dense<0.000000e+00> : vector<8x4xf32>
    %132 = tpu.matmul %131, %122, %cst_51 {dimension_numbers = #tpu.dot_dimension_numbers<[1], [0], [0], [1], [0, 0, 1, 1], [], []>} : vector<8x8xbf16>, vector<8x4xbf16>, vector<8x4xf32> -> vector<8x4xf32>
    %133 = tpu.reciprocal %130 {approx = true} : vector<8x1xf32> -> vector<8x1xf32>
    %134 = vector.broadcast %133 : vector<8x1xf32> to vector<8x4xf32>
    %135 = arith.mulf %132, %134 : vector<8x4xf32>
    %136 = arith.truncf %135 : vector<8x4xf32> to vector<8x4xbf16>
    %c5 = arith.constant 5 : index
    %c0_52 = arith.constant 0 : index
    %c0_53 = arith.constant 0 : index
    %137 = vector.load %arg10[%c5, %c0_52, %c0_53] : memref<8x4x32xbf16, #tpu.memory_space<vmem>>, vector<1x4x32xbf16>
    %138 = vector.shape_cast %137 : vector<1x4x32xbf16> to vector<4x32xbf16>
    %cst_54 = arith.constant dense<0.000000e+00> : vector<8x32xf32>
    %139 = tpu.matmul %136, %138, %cst_54 {dimension_numbers = #tpu.dot_dimension_numbers<[1], [0], [0], [1], [0, 0, 1, 1], [], []>} : vector<8x4xbf16>, vector<4x32xbf16>, vector<8x32xf32> -> vector<8x32xf32>
    %140 = arith.addf %119, %139 : vector<8x32xf32>
    %141 = vector.extract_strided_slice %11 {offsets = [0, 24], sizes = [8, 4], strides = [1, 1]} : vector<8x32xbf16> to vector<8x4xbf16>
    %142 = vector.extract_strided_slice %12 {offsets = [0, 24], sizes = [8, 4], strides = [1, 1]} : vector<8x32xbf16> to vector<8x4xbf16>
    %143 = vector.extract_strided_slice %13 {offsets = [0, 24], sizes = [8, 4], strides = [1, 1]} : vector<8x32xbf16> to vector<8x4xbf16>
    %cst_55 = arith.constant dense<0.000000e+00> : vector<8x8xf32>
    %144 = tpu.matmul %141, %142, %cst_55 {dimension_numbers = #tpu.dot_dimension_numbers<[1], [1], [0], [0], [0, 0, 1, 0], [], []>} : vector<8x4xbf16>, vector<8x4xbf16>, vector<8x8xf32> -> vector<8x8xf32>
    %cst_56 = arith.constant dense<0xFF800000> : vector<8xf32>
    %145 = vector.multi_reduction <maximumf>, %144, %cst_56 [1] : vector<8x8xf32> to vector<8xf32>
    %146 = vector.shape_cast %145 : vector<8xf32> to vector<8x1xf32>
    %147 = vector.broadcast %146 : vector<8x1xf32> to vector<8x8xf32>
    %148 = arith.subf %144, %147 : vector<8x8xf32>
    %149 = math.exp %148 : vector<8x8xf32>
    %cst_57 = arith.constant dense<0.000000e+00> : vector<8xf32>
    %150 = vector.multi_reduction <add>, %149, %cst_57 [1] : vector<8x8xf32> to vector<8xf32>
    %151 = vector.shape_cast %150 : vector<8xf32> to vector<8x1xf32>
    %152 = arith.truncf %149 : vector<8x8xf32> to vector<8x8xbf16>
    %cst_58 = arith.constant dense<0.000000e+00> : vector<8x4xf32>
    %153 = tpu.matmul %152, %143, %cst_58 {dimension_numbers = #tpu.dot_dimension_numbers<[1], [0], [0], [1], [0, 0, 1, 1], [], []>} : vector<8x8xbf16>, vector<8x4xbf16>, vector<8x4xf32> -> vector<8x4xf32>
    %154 = tpu.reciprocal %151 {approx = true} : vector<8x1xf32> -> vector<8x1xf32>
    %155 = vector.broadcast %154 : vector<8x1xf32> to vector<8x4xf32>
    %156 = arith.mulf %153, %155 : vector<8x4xf32>
    %157 = arith.truncf %156 : vector<8x4xf32> to vector<8x4xbf16>
    %c6 = arith.constant 6 : index
    %c0_59 = arith.constant 0 : index
    %c0_60 = arith.constant 0 : index
    %158 = vector.load %arg10[%c6, %c0_59, %c0_60] : memref<8x4x32xbf16, #tpu.memory_space<vmem>>, vector<1x4x32xbf16>
    %159 = vector.shape_cast %158 : vector<1x4x32xbf16> to vector<4x32xbf16>
    %cst_61 = arith.constant dense<0.000000e+00> : vector<8x32xf32>
    %160 = tpu.matmul %157, %159, %cst_61 {dimension_numbers = #tpu.dot_dimension_numbers<[1], [0], [0], [1], [0, 0, 1, 1], [], []>} : vector<8x4xbf16>, vector<4x32xbf16>, vector<8x32xf32> -> vector<8x32xf32>
    %161 = arith.addf %140, %160 : vector<8x32xf32>
    %162 = vector.extract_strided_slice %11 {offsets = [0, 28], sizes = [8, 4], strides = [1, 1]} : vector<8x32xbf16> to vector<8x4xbf16>
    %163 = vector.extract_strided_slice %12 {offsets = [0, 28], sizes = [8, 4], strides = [1, 1]} : vector<8x32xbf16> to vector<8x4xbf16>
    %164 = vector.extract_strided_slice %13 {offsets = [0, 28], sizes = [8, 4], strides = [1, 1]} : vector<8x32xbf16> to vector<8x4xbf16>
    %cst_62 = arith.constant dense<0.000000e+00> : vector<8x8xf32>
    %165 = tpu.matmul %162, %163, %cst_62 {dimension_numbers = #tpu.dot_dimension_numbers<[1], [1], [0], [0], [0, 0, 1, 0], [], []>} : vector<8x4xbf16>, vector<8x4xbf16>, vector<8x8xf32> -> vector<8x8xf32>
    %cst_63 = arith.constant dense<0xFF800000> : vector<8xf32>
    %166 = vector.multi_reduction <maximumf>, %165, %cst_63 [1] : vector<8x8xf32> to vector<8xf32>
    %167 = vector.shape_cast %166 : vector<8xf32> to vector<8x1xf32>
    %168 = vector.broadcast %167 : vector<8x1xf32> to vector<8x8xf32>
    %169 = arith.subf %165, %168 : vector<8x8xf32>
    %170 = math.exp %169 : vector<8x8xf32>
    %cst_64 = arith.constant dense<0.000000e+00> : vector<8xf32>
    %171 = vector.multi_reduction <add>, %170, %cst_64 [1] : vector<8x8xf32> to vector<8xf32>
    %172 = vector.shape_cast %171 : vector<8xf32> to vector<8x1xf32>
    %173 = arith.truncf %170 : vector<8x8xf32> to vector<8x8xbf16>
    %cst_65 = arith.constant dense<0.000000e+00> : vector<8x4xf32>
    %174 = tpu.matmul %173, %164, %cst_65 {dimension_numbers = #tpu.dot_dimension_numbers<[1], [0], [0], [1], [0, 0, 1, 1], [], []>} : vector<8x8xbf16>, vector<8x4xbf16>, vector<8x4xf32> -> vector<8x4xf32>
    %175 = tpu.reciprocal %172 {approx = true} : vector<8x1xf32> -> vector<8x1xf32>
    %176 = vector.broadcast %175 : vector<8x1xf32> to vector<8x4xf32>
    %177 = arith.mulf %174, %176 : vector<8x4xf32>
    %178 = arith.truncf %177 : vector<8x4xf32> to vector<8x4xbf16>
    %c7 = arith.constant 7 : index
    %c0_66 = arith.constant 0 : index
    %c0_67 = arith.constant 0 : index
    %179 = vector.load %arg10[%c7, %c0_66, %c0_67] : memref<8x4x32xbf16, #tpu.memory_space<vmem>>, vector<1x4x32xbf16>
    %180 = vector.shape_cast %179 : vector<1x4x32xbf16> to vector<4x32xbf16>
    %cst_68 = arith.constant dense<0.000000e+00> : vector<8x32xf32>
    %181 = tpu.matmul %178, %180, %cst_68 {dimension_numbers = #tpu.dot_dimension_numbers<[1], [0], [0], [1], [0, 0, 1, 1], [], []>} : vector<8x4xbf16>, vector<4x32xbf16>, vector<8x32xf32> -> vector<8x32xf32>
    %182 = arith.addf %161, %181 : vector<8x32xf32>
    %c0_69 = arith.constant 0 : index
    %c0_70 = arith.constant 0 : index
    %183 = vector.load %arg11[%c0_69, %c0_70] : memref<1x32xf32, #tpu.memory_space<vmem>>, vector<1x32xf32>
    %184 = vector.broadcast %183 : vector<1x32xf32> to vector<8x32xf32>
    %185 = arith.addf %182, %184 : vector<8x32xf32>
    %186 = arith.addf %185, %4 : vector<8x32xf32>
    %cst_71 = arith.constant dense<0.000000e+00> : vector<8xf32>
    %187 = vector.multi_reduction <add>, %186, %cst_71 [1] : vector<8x32xf32> to vector<8xf32>
    %188 = vector.shape_cast %187 : vector<8xf32> to vector<8x1xf32>
    %cst_72 = arith.constant 3.200000e+01 : f32
    %189 = vector.broadcast %cst_72 : f32 to vector<8x1xf32>
    %190 = arith.divf %188, %189 : vector<8x1xf32>
    %191 = vector.broadcast %190 : vector<8x1xf32> to vector<8x32xf32>
    %192 = arith.subf %186, %191 : vector<8x32xf32>
    %193 = arith.mulf %192, %192 : vector<8x32xf32>
    %cst_73 = arith.constant dense<0.000000e+00> : vector<8xf32>
    %194 = vector.multi_reduction <add>, %193, %cst_73 [1] : vector<8x32xf32> to vector<8xf32>
    %195 = vector.shape_cast %194 : vector<8xf32> to vector<8x1xf32>
    %cst_74 = arith.constant 3.200000e+01 : f32
    %196 = vector.broadcast %cst_74 : f32 to vector<8x1xf32>
    %197 = arith.divf %195, %196 : vector<8x1xf32>
    %198 = vector.broadcast %190 : vector<8x1xf32> to vector<8x32xf32>
    %199 = arith.subf %186, %198 : vector<8x32xf32>
    %cst_75 = arith.constant 9.99999996E-13 : f32
    %200 = vector.broadcast %cst_75 : f32 to vector<8x1xf32>
    %201 = arith.addf %197, %200 : vector<8x1xf32>
    %202 = math.rsqrt %201 : vector<8x1xf32>
    %203 = vector.broadcast %202 : vector<8x1xf32> to vector<8x32xf32>
    %204 = arith.mulf %199, %203 : vector<8x32xf32>
    %c0_76 = arith.constant 0 : index
    %c0_77 = arith.constant 0 : index
    %205 = vector.load %arg12[%c0_76, %c0_77] : memref<1x32xf32, #tpu.memory_space<vmem>>, vector<1x32xf32>
    %206 = vector.broadcast %205 : vector<1x32xf32> to vector<8x32xf32>
    %207 = arith.mulf %204, %206 : vector<8x32xf32>
    %c0_78 = arith.constant 0 : index
    %c0_79 = arith.constant 0 : index
    %208 = vector.load %arg13[%c0_78, %c0_79] : memref<1x32xf32, #tpu.memory_space<vmem>>, vector<1x32xf32>
    %209 = vector.broadcast %208 : vector<1x32xf32> to vector<8x32xf32>
    %210 = arith.addf %207, %209 : vector<8x32xf32>
    %c0_80 = arith.constant 0 : index
    %c0_81 = arith.constant 0 : index
    %c0_82 = arith.constant 0 : index
    %211 = vector.load %arg14[%c0_80, %c0_81, %c0_82] : memref<1x8x32xf32, #tpu.memory_space<vmem>>, vector<1x8x32xf32>
    %212 = vector.shape_cast %211 : vector<1x8x32xf32> to vector<8x32xf32>
    %213 = vector.shape_cast %210 : vector<8x32xf32> to vector<1x8x32xf32>
    tpu.vector_store %arg14[%c0_80, %c0_81, %c0_82], %213 {strides = array<i32>} : memref<1x8x32xf32, #tpu.memory_space<vmem>>, vector<1x8x32xf32>,
    return
  }
  func.func @transform_0(%arg0: i32, %arg1: i32) -> (i32, i32, i32) {
    %c0_i32 = arith.constant 0 : i32
    %c0_i32_0 = arith.constant 0 : i32
    return %arg0, %arg1, %c0_i32 : i32, i32, i32
  }
  func.func @transform_1(%arg0: i32, %arg1: i32) -> (i32, i32, i32) {
    %c0_i32 = arith.constant 0 : i32
    %c0_i32_0 = arith.constant 0 : i32
    %c0_i32_1 = arith.constant 0 : i32
    return %arg0, %c0_i32, %c0_i32_0 : i32, i32, i32
  }
  func.func @transform_2(%arg0: i32, %arg1: i32) -> (i32, i32) {
    %c0_i32 = arith.constant 0 : i32
    %c0_i32_0 = arith.constant 0 : i32
    %c0_i32_1 = arith.constant 0 : i32
    return %c0_i32, %c0_i32_0 : i32, i32
  }
  func.func @transform_3(%arg0: i32, %arg1: i32) -> (i32, i32) {
    %c0_i32 = arith.constant 0 : i32
    %c0_i32_0 = arith.constant 0 : i32
    %c0_i32_1 = arith.constant 0 : i32
    return %c0_i32, %c0_i32_0 : i32, i32
  }
  func.func @transform_4(%arg0: i32, %arg1: i32) -> (i32, i32) {
    %c0_i32 = arith.constant 0 : i32
    %c0_i32_0 = arith.constant 0 : i32
    %c0_i32_1 = arith.constant 0 : i32
    return %c0_i32, %c0_i32_0 : i32, i32
  }
  func.func @transform_5(%arg0: i32, %arg1: i32) -> (i32, i32) {
    %c0_i32 = arith.constant 0 : i32
    %c0_i32_0 = arith.constant 0 : i32
    %c0_i32_1 = arith.constant 0 : i32
    return %c0_i32, %c0_i32_0 : i32, i32
  }
  func.func @transform_6(%arg0: i32, %arg1: i32) -> (i32, i32) {
    %c0_i32 = arith.constant 0 : i32
    %c0_i32_0 = arith.constant 0 : i32
    %c0_i32_1 = arith.constant 0 : i32
    return %c0_i32, %c0_i32_0 : i32, i32
  }
  func.func @transform_7(%arg0: i32, %arg1: i32) -> (i32, i32) {
    %c0_i32 = arith.constant 0 : i32
    %c0_i32_0 = arith.constant 0 : i32
    %c0_i32_1 = arith.constant 0 : i32
    return %c0_i32, %c0_i32_0 : i32, i32
  }
  func.func @transform_8(%arg0: i32, %arg1: i32) -> (i32, i32, i32) {
    %c0_i32 = arith.constant 0 : i32
    %c0_i32_0 = arith.constant 0 : i32
    %c0_i32_1 = arith.constant 0 : i32
    %c0_i32_2 = arith.constant 0 : i32
    return %c0_i32, %c0_i32_0, %c0_i32_1 : i32, i32, i32
  }
  func.func @transform_9(%arg0: i32, %arg1: i32) -> (i32, i32) {
    %c0_i32 = arith.constant 0 : i32
    %c0_i32_0 = arith.constant 0 : i32
    %c0_i32_1 = arith.constant 0 : i32
    return %c0_i32, %c0_i32_0 : i32, i32
  }
  func.func @transform_10(%arg0: i32, %arg1: i32) -> (i32, i32) {
    %c0_i32 = arith.constant 0 : i32
    %c0_i32_0 = arith.constant 0 : i32
    %c0_i32_1 = arith.constant 0 : i32
    return %c0_i32, %c0_i32_0 : i32, i32
  }
  func.func @transform_11(%arg0: i32, %arg1: i32) -> (i32, i32) {
    %c0_i32 = arith.constant 0 : i32
    %c0_i32_0 = arith.constant 0 : i32
    %c0_i32_1 = arith.constant 0 : i32
    return %c0_i32, %c0_i32_0 : i32, i32
  }
  func.func @transform_12(%arg0: i32, %arg1: i32) -> (i32, i32, i32) {
    %c0_i32 = arith.constant 0 : i32
    %c0_i32_0 = arith.constant 0 : i32
    return %arg0, %arg1, %c0_i32 : i32, i32, i32
  }
}

</mosaic_0001>

<bundles_post_ra>
// kernel: tpu_custom_call.1
= control target key start
LH: loop header
LB: loop body
LE: loop exit
PB: predicated region body
PF: predicated region fallthrough
CT: control target
= control target key end

     0   :  { %s3481_s0 = inlined_call_operand.hbm [shape: f32[2,8,32], index: 0, kind: input, shape index: {}]   ;;  %s3482_s1 = inlined_call_operand.hbm [shape: f32[2,8,32], index: 1, kind: input, shape index: {}]   ;;  %s3483_s2 = inlined_call_operand.hbm [shape: bf16[32,32], index: 2, kind: input, shape index: {}]   ;;  %s3484_s3 = inlined_call_operand.vmem [shape: f32[1,32], index: 3, kind: input, shape index: {}]   ;;  %s3485_s4 = inlined_call_operand.hbm [shape: bf16[32,32], index: 4, kind: input, shape index: {}]   ;;  %s3486_s5 = inlined_call_operand.vmem [shape: f32[1,32], index: 5, kind: input, shape index: {}]   ;;  %s3487_s6 = inlined_call_operand.hbm [shape: bf16[32,32], index: 6, kind: input, shape index: {}]   ;;  %s3488_s7 = inlined_call_operand.vmem [shape: f32[1,32], index: 7, kind: input, shape index: {}]   ;;  %s3489_s8 = inlined_call_operand.hbm [shape: bf16[8,4,32], index: 8, kind: input, shape index: {}]   ;;  %s3490_s9 = inlined_call_operand.vmem [shape: f32[1,32], index: 9, kind: input, shape index: {}]   ;;  %s3491_s10 = inlined_call_operand.vmem [shape: f32[1,32], index: 10, kind: input, shape index: {}]   ;;  %s3492_s11 = inlined_call_operand.vmem [shape: f32[1,32], index: 11, kind: input, shape index: {}]   ;;  %s3493_s12 = inlined_call_operand.hbm [shape: f32[2,8,32], index: 12, kind: output, shape index: {}]  }
   0x1   :  { %3499 = sst [smem:[#allocation26_spill]] %s3481_s0 }
   0x2   :  { %3500 = sst [smem:[#allocation27_spill]] %s3483_s2 }
   0x3   :  { %3501 = sst [smem:[#allocation28_spill]] %s3485_s4 }
   0x4   :  { %3502 = sst [smem:[#allocation29_spill]] %s3487_s6 }
   0x5   :  { %3503 = sst [smem:[#allocation30_spill]] %s3489_s8 }
   0x6   :  { %3504 = sst [smem:[#allocation31_spill]] %s3493_s12 }
   0x7   :  { %17 = vsyncpa [#allocation5], 0 }
   0x8   :  { %19 = vsyncpa [#allocation5 + $0x1], 0 }
   0x9   :  { %20 = vsyncpa [#allocation8], 0 }
   0xa   :  { %22 = vsyncpa [#allocation8 + $0x1], 0 }
   0xb   :  { %23 = vsyncpa [#allocation11], 0 }
   0xc   :  { %24 = vsyncpa [#allocation14], 0 }
   0xd   :  { %25 = vsyncpa [#allocation6], 0 }
   0xe   :  { %27 = vsyncpa [#allocation6 + $0x1], 0  ;;  %s3029_s21 = smov 0   ;;  %s3031_s22 = smov 0  }
   0xf   :  { %s3033_s23 = smov 0   ;;  %s3035_s24 = smov 0  }
  0x10   :  { %s3037_s25 = smov 0   ;;  %s3039_s26 = smov 0  }
  0x11 LB: > { %3505 = sst [smem:[#allocation22_spill]] %s2922_s21  ;;  %s3060_s27 = sadd.s32 4294967295, %s2942_s26   ;;  %s2942_s26 = sphi %s3039_s26, %s33_s26   ;;  %s2938_s25 = sphi %s3037_s25, %s3533_s25   ;;  %s2934_s24 = sphi %s3035_s24, %s3532_s24   ;;  %s2930_s23 = sphi %s3033_s23, %s3536_s23   ;;  %s2926_s22 = sphi %s3031_s22, %s3535_s22   ;;  %s2922_s21 = sphi %s3029_s21, %s3534_s21  }
  0x12   : > { %3506 = sst [smem:[#allocation23_spill]] %s2938_s25  ;;  %p2235_p0 = scmp.ge.s32.totalorder %s2942_s26, 1 }
  0x13   : > { %p3495_p1 = scmp.eq.s32.totalorder %s3060_s27, 0  ;;  %p342_p2 = scmp.lt.s32.totalorder %s2942_s26, 3 }
  0x14   : > { %s2944_s29 = smov [#allocation9]   ;;  %s2945_s14 = smov [#allocation10]  }
  0x15   : > { %p3065_p3 = pnand %p2235_p0, %p342_p2  ;;  %s354_s30 = sshll.u32 %s2944_s29, 4  ;;  %s355_s30 = int_to_ptr.vmem [resolvable:$true] %s354_s30 }
  0x16   : > { %s370_s15 = sshll.u32 %s2945_s14, 4  ;;  %s2946_s16 = smov [#allocation12]   ;;  %s371_s15 = int_to_ptr.vmem [resolvable:$true] %s370_s15 }
  0x17   : > { %p2545_p4 = pneg %p3065_p3  ;;  %s386_s17 = sshll.u32 %s2946_s16, 4  ;;  %s387_s17 = int_to_ptr.vmem [resolvable:$true] %s386_s17 }
  0x18   : > { %s2697_s18 = scalar_lea.vmem %s355_s30, 256  ;;  %p2705_p11 = scmp.lt.s32.totalorder %s355_s30, %s355_s30 }
  0x19   : > { %p3074_p6 = pnand %p2545_p4, %p3495_p1  ;;  %p2698_p8 = scmp.ne.s32.totalorder %s355_s30, %s2697_s18 }
  0x1a   : > { %p2706_p12 = scmp.lt.s32.totalorder %s2697_s18, %s2697_s18 }
  0x1b   : > { %p2688_p7 = pneg %p3074_p6 }
  0x1c   : > { %p2707_p13 = por %p2706_p12, %p2705_p11 }
  0x1d   : > { %p2700_p9 = pnand %p2698_p8, %p2688_p7 }
  0x1f   : > { %p2701_p10 = pneg %p2700_p9 }
  0x21   : > { %p2708_p0 = pnand %p2707_p13, %p2701_p10 }
  0x23   : > { %2711 = shalt.err (!%p2708_p0)
}
  0x24   : > { %s2947_s19 = smov 64   ;;  %s2948_s20 = smov 4  }
  0x25   : > { %s3509_s2 = sld [smem:[#allocation27_spill]]  ;;  %s2723_s16 = scalar_lea.vmem %s371_s15, 256 }
  0x26   : > { %p2724_p2 = scmp.ne.s32.totalorder %s371_s15, %s2723_s16  ;;  %p2731_p9 = scmp.lt.s32.totalorder %s371_s15, %s371_s15 }
  0x27   : > { %p2732_p5 = scmp.lt.s32.totalorder %s2723_s16, %s2723_s16 }
  0x28   : > { %p2726_p4 = pnand %p2724_p2, %p2688_p7 }
  0x29   : > { %p2733_p11 = por %p2732_p5, %p2731_p9 }
  0x2a   : > { %p2727_p8 = pneg %p2726_p4 }
  0x2b   : > { %2548 = dma.hbm_to_vmem [thread:$0]  (!%p3074_p6), %s3509_s2, 256, %s355_s30, [#allocation8], %s2947_s19, %s2947_s19, %s2948_s20  }
  0x2c   : > { %p2734_p10 = pnand %p2733_p11, %p2727_p8 }
  0x2e   : > { %2737 = shalt.err (!%p2734_p10)
}
  0x2f   : > { %s3510_s4 = sld [smem:[#allocation28_spill]]  ;;  %s2749_s30 = scalar_lea.vmem %s387_s17, 256 }
  0x30   : > { %p2750_p12 = scmp.ne.s32.totalorder %s387_s17, %s2749_s30  ;;  %p2757_p2 = scmp.lt.s32.totalorder %s387_s17, %s387_s17 }
  0x31   : > { %p2758_p4 = scmp.lt.s32.totalorder %s2749_s30, %s2749_s30 }
  0x32   : > { %p2752_p13 = pnand %p2750_p12, %p2688_p7 }
  0x33   : > { %p2759_p1 = por %p2758_p4, %p2757_p2 }
  0x34   : > { %p2753_p0 = pneg %p2752_p13 }
  0x35   : > { %2551 = dma.hbm_to_vmem [thread:$0]  (!%p3074_p6), %s3510_s4, 256, %s371_s15, [#allocation11], %s2947_s19, %s2947_s19, %s2948_s20  }
  0x36   : > { %p2760_p5 = pnand %p2759_p1, %p2753_p0 }
  0x38   : > { %2763 = shalt.err (!%p2760_p5)
}
  0x39   : > { %s3511_s6 = sld [smem:[#allocation29_spill]]  ;;  %s2949_s12 = smov [#allocation13]  }
  0x3a   : > { %s402_s15 = sshll.u32 %s2949_s12, 4  ;;  %s403_s15 = int_to_ptr.vmem [resolvable:$true] %s402_s15 }
  0x3b   : > { %s2775_s16 = scalar_lea.vmem %s403_s15, 256  ;;  %p2783_p10 = scmp.lt.s32.totalorder %s403_s15, %s403_s15 }
  0x3c   : > { %p2776_p8 = scmp.ne.s32.totalorder %s403_s15, %s2775_s16  ;;  %p2784_p12 = scmp.lt.s32.totalorder %s2775_s16, %s2775_s16 }
  0x3e   : > { %p2778_p9 = pnand %p2776_p8, %p2688_p7  ;;  %p2785_p1 = por %p2784_p12, %p2783_p10 }
  0x3f   : > { %2554 = dma.hbm_to_vmem [thread:$0]  (!%p3074_p6), %s3511_s6, 256, %s387_s17, [#allocation11], %s2947_s19, %s2947_s19, %s2948_s20  }
  0x40   : > { %p2779_p11 = pneg %p2778_p9 }
  0x42   : > { %p2786_p13 = pnand %p2785_p1, %p2779_p11 }
  0x44   : > { %2789 = shalt.err (!%p2786_p13)
}
  0x45   : > { %s2950_s18 = smov 32   ;;  %s2951_s17 = smov 2  }
  0x46   : > { %s3512_s8 = sld [smem:[#allocation30_spill]]  ;;  %s2234_s30 = sadd.s32 4294967294, %s2942_s26  }
  0x47   : > { %s45_s29 = sadd.s32 1, %s2938_s25  ;;  %s54_s14 = sadd.s32 1, %s2930_s23 }
  0x48   : > { %p47_p7 = scmp.ge.s32.totalorder %s45_s29, 2  ;;  %p61_p0 = scmp.ne.s32.totalorder %s2930_s23, %s2926_s22 }
  0x49   : > { %p62_p2 = scmp.eq.s32.totalorder %s2942_s26, 0  ;;  %p67_p5 = scmp.ne.s32.totalorder %s2926_s22, %s2922_s21 }
  0x4a   : > { %s3538_s29 = smov (%p47_p7, %s45_s29), 0  ;;  %p3515_p9 = scmp.eq.s32.totalorder %s3060_s27, 0 }
  0x4b   : > { %3513 = sst [smem:[#allocation24_spill]] %s3538_s29  ;;  %p3120_p4 = por %p62_p2, %p61_p0 }
  0x4c   : > { %2557 = dma.hbm_to_vmem [thread:$0]  (!%p3074_p6), %s3512_s8, 256, %s403_s15, [#allocation14], %s2950_s18, %s2950_s18, %s2951_s17  }
  0x4d   : > { %s49_s13 = ssub.s32 %s2938_s25, %s3538_s29  ;;  %p329_p6 = scmp.eq.s32.totalorder %s3060_s27, 1 }
  0x4e   : > { %p52_p8 = scmp.eq.s32.totalorder %s49_s13, 0  ;;  %p3131_p11 = por %p3515_p9, %p67_p5 }
  0x4f   : > { %p3135_p10 = por %p329_p6, %p61_p0  ;;  %p335_p12 = scmp.eq.s32.totalorder %s2234_s30, 1 }
  0x50   : > { %s3140_s18 = scalar_select %p52_p8, %s2930_s23, %s54_s14  }
  0x51   : > { %p3142_p1 = por %p335_p12, %p67_p5  ;;  %p2573_p13 = scmp.lt.s32.totalorder %s2942_s26, 2 }
  0x52   : > { %3518 = sst [smem:[#allocation25_spill]] %s3140_s18  ;;  %s425_s19 = sand.u32 1, %s2930_s23  }
  0x53   : > { %s2242_s20 = sshll.u32 %s2938_s25, 7  ;;  %s2241_s13 = sshll.u32 %s425_s19, 3 }
  0x54   : > { %s3520_s0 = sld [smem:[#allocation26_spill]]  ;;  %s429_s8 = scalar_lea.vmem [#allocation4], %s2241_s13 }
  0x55   : > { %s437_s29 = sshll.u32 %s429_s8, 4  ;;  %p3154_p7 = pnand %p2573_p13, %p3120_p4  ;;  %s438_s29 = int_to_ptr.vmem [resolvable:$true] %s437_s29 }
  0x56   : > { %s3161_s18 = scalar_lea.hbm %s3482_s1, %s2242_s20  ;;  %s426_s25 = scalar_lea.sflag [#allocation5], %s425_s19 }
  0x57   : > { %p2792_p0 = pneg %p3154_p7  ;;  %s2803_s2 = scalar_lea.vmem %s438_s29, 128 }
  0x58   : > { %p2804_p2 = scmp.ne.s32.totalorder %s438_s29, %s2803_s2  ;;  %s2952_s4 = smov [#allocation4]  }
  0x59   : > { %s2808_s8 = sshll.u32 %s2952_s4, 4  ;;  %s2809_s8 = int_to_ptr.vmem [resolvable:$false] %s2808_s8 }
  0x5a   : > { %s435_s6 = scalar_lea.hbm %s3520_s0, %s2242_s20  ;;  %p2806_p5 = pnand %p2804_p2, %p2792_p0 }
  0x5b   : > { %s2810_s12 = scalar_lea.vmem %s2809_s8, 256  ;;  %p2811_p6 = scmp.lt.s32.totalorder %s438_s29, %s2809_s8 }
  0x5c   : > { %p2807_p4 = pneg %p2806_p5  ;;  %p2812_p8 = scmp.lt.s32.totalorder %s2810_s12, %s2803_s2 }
  0x5e   : > { %p2813_p9 = por %p2812_p8, %p2811_p6 }
  0x60   : > { %p2814_p12 = pnand %p2813_p9, %p2807_p4 }
  0x62   : > { %2817 = shalt.err (!%p2814_p12)
}
  0x63   : > { %2561 = dma.hbm_to_vmem [thread:$0]  (!%p3154_p7), %s435_s6, 128, %s438_s29, %s426_s25  }
  0x64   : > { %s444_s19 = sand.u32 1, %s2942_s26   ;;  %s448_s20 = scalar_lea.vmem [#allocation7], %s2241_s13 }
  0x65   : > { %s455_s30 = sshll.u32 %s448_s20, 4  ;;  %s445_s14 = scalar_lea.sflag [#allocation8], %s444_s19  ;;  %s456_s30 = int_to_ptr.vmem [resolvable:$true] %s455_s30 }
  0x66   : > { %s2831_s0 = scalar_lea.vmem %s456_s30, 128  ;;  %s2953_s2 = smov [#allocation7]  }
  0x67   : > { %p2832_p13 = scmp.ne.s32.totalorder %s456_s30, %s2831_s0  ;;  %s2836_s4 = sshll.u32 %s2953_s2, 4  ;;  %s2837_s4 = int_to_ptr.vmem [resolvable:$false] %s2836_s4 }
  0x68   : > { %s2838_s8 = scalar_lea.vmem %s2837_s4, 256  ;;  %p2839_p4 = scmp.lt.s32.totalorder %s456_s30, %s2837_s4 }
  0x69   : > { %p2834_p2 = pnand %p2832_p13, %p2792_p0  ;;  %p2840_p6 = scmp.lt.s32.totalorder %s2838_s8, %s2831_s0 }
  0x6b   : > { %p2835_p5 = pneg %p2834_p2  ;;  %p2841_p8 = por %p2840_p6, %p2839_p4 }
  0x6d   : > { %p2842_p9 = pnand %p2841_p8, %p2835_p5 }
  0x6f   : > { %2845 = shalt.err (!%p2842_p9)
}
  0x70   : > { %2564 = dma.hbm_to_vmem [thread:$0]  (!%p3154_p7), %s3161_s18, 128, %s456_s30, %s445_s14  }
  0x71   : > { %464 = sbr.rel (%p3065_p3) target bundleno = 3897 (0xf39), region = 68  ;;  %s3180_s6 = sand.u32 (!%p3065_p3), 1, %s2926_s22  }
  0x72   : > { %s3183_s25 = sshll.u32 (!%p3065_p3), %s3180_s6, 3  ;;  %s467_s0 = scalar_lea.sflag (!%p3065_p3), [#allocation5], %s3180_s6 }
  0x73   : > { %s470_s29 = scalar_lea.vmem (!%p3065_p3), [#allocation4], %s3183_s25 }
  0x76   : > { %2897 = dma.done.wait (%p3131_p11), %s467_s0, 128  }
  0x77   : > { %2899 = vsyncadd (%p3131_p11), %s467_s0, 4294967168  ;;  %s475_s21 = sand.u32 1, %s3060_s27   ;;  %s479_s18 = scalar_lea.vmem [#allocation7], %s3183_s25 }
  0x78   : > { %s476_s28 = scalar_lea.sflag [#allocation8], %s475_s21 }
  0x79   : > { %2901 = dma.done.wait (%p3131_p11), %s476_s28, 128  }
  0x7a   : > { %2903 = vsyncadd (%p3131_p11), %s476_s28, 4294967168  ;;  %p3522_p3 = scmp.eq.s32.totalorder %s3060_s27, 0 }
  0x7c   : > { %2905 = dma.done.wait (%p3522_p3), [#allocation8], 256   ;;  %p3523_p7 = pmov %p3522_p3 }
  0x7d   : > { %p3524_p0 = pmov %p3522_p3 }
  0x7e   : > { %2907 = vsyncadd (%p3523_p7), [#allocation8], 4294967040 }
  0x7f   : > { %2909 = dma.done.wait (%p3524_p0), [#allocation11], 512   ;;  %p3525_p12 = pmov %p3524_p0 }
  0x80   : > { %p3526_p13 = pmov %p3524_p0 }
  0x81   : > { %2911 = vsyncadd (%p3525_p12), [#allocation11], 4294966784 }
  0x82   : > { %2913 = dma.done.wait (%p3526_p13), [#allocation14], 256   ;;  %p3527_p2 = pmov %p3524_p0 }
  0x83   : > { %v2954_v0 = vmov 0.0   ;;  %vm2955_vm0 = vmmov 0   ;;  %v2644_v1 = vld [vmem:[#allocation10 + $0x8] sm:$0xff]   ;;  %v2645_v2 = vld [vmem:[#allocation10] sm:$0xff]   ;;  %v2646_v4 = vld [vmem:[#allocation12 + $0x8] sm:$0xff]   ;;  %vm571_vm1 = vcmask 261120  }
  0x84   : > { %2915 = vsyncadd (%p3527_p2), [#allocation14], 4294967040  ;;  %2355 = vmatprep.subr.bf16.mxu0 %v2954_v0  ;;  %2359 = vmatprep.mubr.msk.bf16.mxu0 %vm2955_vm0, %v2954_v0  ;;  %v546_v3 = vld [vmem:[%s479_s18] sm:$0xff]  ;;  %v2647_v6 = vld [vmem:[#allocation12] sm:$0xff]   ;;  %vm679_vm2 = vcmask 257024   ;;  %vm755_vm3 = vcmask 31744  }
  0x85   : > { %2363 = vmatprep.subr.bf16.mxu1 %v2954_v0  ;;  %2367 = vmatprep.mubr.msk.bf16.mxu1 %vm2955_vm0, %v2954_v0  ;;  %v547_v5 = vpack.c.bf16 %v546_v3, %v546_v3  ;;  %v2648_v7 = vld [vmem:[#allocation9 + $0x8] sm:$0xff]   ;;  %v2649_v8 = vld [vmem:[#allocation9] sm:$0xff]   ;;  %v2253_v11 = vld [vmem:[%s3486_s5] ss:$0 sm:$0xff]  ;;  %s2956_s30 = smov 124   ;;  %s2957_s14 = smov 120  }
  0x86   : > { %2356 = vmatpush3.bf16.msra.mxu0 %v2644_v1  ;;  %2364 = vmatpush3.bf16.msra.mxu1 %v2646_v4  ;;  %v3223_v9 = vld [vmem:[%s470_s29] sm:$0xff]  ;;  %v2257_v14 = vld [vmem:[%s3488_s7] ss:$0 sm:$0xff]  ;;  %vm816_vm4 = vcmask 1043456   ;;  %vm802_vm5 = vcmask 64512   ;;  %s2958_s2 = smov 116  }
  0x87   : > { %2357 = vmatprep.subr.bf16.mxu0 %v2954_v0  ;;  %2365 = vmatprep.subr.bf16.mxu1 %v2954_v0  ;;  %v684_v10 = vpack.c.bf16 %v3223_v9, %v3223_v9  ;;  %v2261_v24 = vld [vmem:[%s3484_s3] ss:$0 sm:$0xff]  ;;  %v863_v62 = vld [vmem:[#allocation13] sm:$0x3]  ;;  %vm987_vm6 = vcmask 1041408   ;;  %s2959_s4 = smov 112  }
  0x88   : > { %v1035_v3 = vsel %vm987_vm6, %v863_v62, 0  ;;  %v983_v4 = vld [vmem:[#allocation13 + $0x2] sm:$0x3]  ;;  %s2960_s8 = smov 108   ;;  %s2961_s0 = smov 104  }
  0x89   : > { %s2962_s29 = smov 100   ;;  %s2295_s12 = sshll.u32 %s2934_s24, 7 }
  0x8a   : > { %2358 = vmatpush3.bf16.msra.mxu0 %v2645_v2  ;;  %2366 = vmatpush3.bf16.msra.mxu1 %v2647_v6  ;;  %s540_s19 = scalar_lea.vmem [#allocation15], %s3183_s25 }
  0x8b   : > { %2371 = vmatprep.subr.bf16.mxu0 %v2954_v0  ;;  %2379 = vmatprep.subr.bf16.mxu1 %v2954_v0  ;;  %s2092_s20 = sshll.u32 %s540_s19, 4  ;;  %s2093_s20 = int_to_ptr.vmem [resolvable:$true] %s2092_s20 }
  0x8d   : > { %2360 = vmatmul.mubr.msk.bf16.vlgmr.msra.gmra.mxu0 %vm571_vm1, %v547_v5  ;;  %2368 = vmatmul.mubr.msk.bf16.vlgmr.msra.gmra.mxu1 %vm571_vm1, %v547_v5  ;;  %v989_v5 = vsel %vm987_vm6, %v983_v4, 0 }
  0x8e   : > { %2372 = vmatpush3.bf16.msra.mxu0 %v2648_v7  ;;  %2375 = vmatprep.mubr.msk.bf16.mxu0 %vm2955_vm0, %v2954_v0 }
  0x8f   : > { %2373 = vmatprep.subr.bf16.mxu0 %v2954_v0  ;;  %2381 = vmatprep.mubr.msk.bf16.mxu1 %vm2955_vm0, %v2954_v0 }
  0x92   : > { %2374 = vmatpush3.bf16.msra.mxu0 %v2649_v8 }
  0x93   : > { %2385 = vmatprep.subr.bf16.mxu0 %v2954_v0 }
  0x95   : > { %2376 = vmatmul.mubr.msk.bf16.vlgmr.msra.gmra.mxu0 %vm571_vm1, %v684_v10 }
  0x96   : > { %2387 = vmatprep.mubr.msk.bf16.mxu0 %vm2955_vm0, %v2954_v0 }
 0x14d   : > { %v609_v12 = vpop.f32.mrf.mxu0  ;;  %v672_v17 = vpop.f32.mrf.mxu1 }
 0x14e   : > { %v610_v13 = vadd.f32 %v2253_v11, %v609_v12  ;;  %v673_v19 = vadd.f32 %v2257_v14, %v672_v17 }
 0x14f   : > { %v2361_v15 = vpop.f32.mrf.mxu0  ;;  %v2369_v20 = vpop.f32.mrf.mxu1 }
 0x150   : > { %v678_v16 = vpack.c.bf16 %v610_v13, %v610_v13  ;;  %v681_v22 = vpack.c.bf16 %v673_v19, %v673_v19 }
 0x151   : > { %v612_v18 = vpop.f32.mrf.mxu0  ;;  %v675_v23 = vpop.f32.mrf.mxu1 }
 0x152   : > { %680 = vst.msk [vmem:[#allocation2] sm:$0xf] %vm679_vm2, %v678_v16  ;;  %682 = vst.msk [vmem:[#allocation3] sm:$0xf] %vm679_vm2, %v681_v22 }
 0x153   : > { %v2362_v21 = vpop.f32.mrf.mxu0  ;;  %v2370_v26 = vpop.f32.mrf.mxu1 }
 0x155   : > { %v746_v25 = vpop.f32.mrf.mxu0 }
 0x156   : > { %v747_v28 = vadd.f32 %v2261_v24, %v746_v25 }
 0x157   : > { %v2377_v27 = vpop.f32.mrf.mxu0 }
 0x158   : > { %v3248_v34 = vpack.c.bf16 %v747_v28, %v747_v28 }
 0x159   : > { %v753_v29 = vld [vmem:[#allocation2] sm:$0xf]  ;;  %v749_v30 = vpop.f32.mrf.mxu0  ;;  %v754_v35 = vld [vmem:[#allocation3] sm:$0xf] }
 0x15a   : > { %v760_v31 = vsel %vm755_vm3, %v753_v29, 0  ;;  %v3246_v32 = vcombine.low %v753_v29, %v753_v29  ;;  %v3253_v36 = vcombine.low %v754_v35, %v754_v35  ;;  %v818_v37 = vsel %vm816_vm4, %v754_v35, 0 }
 0x15b   : > { %2380 = vmatpush3.bf16.xpose.msra.mxu1 %v760_v31  ;;  %v2378_v33 = vpop.f32.mrf.mxu0  ;;  %2386 = vmatpush3.bf16.msra.mxu0 %v818_v37 }
 0x15c   : > { %870 = vrot.lane.b32.xlu0 %v3246_v32, %s2956_s30  ;;  %2391 = vmatprep.subr.bf16.mxu1 %v2954_v0 }
 0x15d   : > { %2397 = vmatprep.subr.bf16.mxu0 %v2954_v0 }
 0x160   : > { %865 = vrot.lane.b32.xlu0 %v3248_v34, %s2956_s30 }
 0x162   : > { %2382 = vmatmul.mubr.msk.bf16.vlgmr.msra.gmra.mxu1 %vm755_vm3, %v3248_v34 }
 0x163   : > { %2393 = vmatprep.mubr.msk.bf16.mxu1 %vm2955_vm0, %v2954_v0 }
 0x164   : > { %931 = vrot.lane.b32.xlu0 %v3253_v36, %s2956_s30 }
 0x168   : > { %1079 = vrot.lane.b32.xlu0 %v3246_v32, %s2957_s14 }
 0x1ce   : > { %v871_v38 = vpop.permute.xlu0 %870 }
 0x1cf   : > { %v876_v39 = vsel %vm755_vm3, %v871_v38, 0 }
 0x1d0   : > { %2392 = vmatpush3.bf16.xpose.msra.mxu1 %v876_v39 }
 0x1d1   : > { %2403 = vmatprep.subr.bf16.mxu1 %v2954_v0 }
 0x1d2   : > { %v866_v40 = vpop.permute.xlu0 %865 }
 0x1d6   : > { %v932_v55 = vpop.permute.xlu0 %931 }
 0x1d7   : > { %2394 = vmatmul.mubr.msk.bf16.vlgmr.msra.gmra.mxu1 %vm755_vm3, %v866_v40  ;;  %v937_v56 = vsel %vm816_vm4, %v932_v55, 0 }
 0x1d8   : > { %2405 = vmatprep.mubr.msk.bf16.mxu1 %vm2955_vm0, %v2954_v0  ;;  %2404 = vmatpush3.bf16.msra.mxu1 %v989_v5 }
 0x1d9   : > { %2415 = vmatprep.subr.bf16.mxu1 %v2954_v0 }
 0x1da   : > { %v1080_v6 = vpop.permute.xlu0 %1079 }
 0x1db   : > { %v1085_v25 = vsel %vm755_vm3, %v1080_v6, 0 }
 0x222   : > { %v796_v41 = vpop.f32.mrf.mxu1 }
 0x223   : > { %v803_v42 = vsel %vm802_vm5, %v796_v41, -inf }
 0x224   : > { %804 = vmax.xlane.f32.xlu1 %v803_v42  ;;  %v2383_v43 = vpop.f32.mrf.mxu1 }
 0x226   : > { %v799_v44 = vpop.f32.mrf.mxu1 }
 0x228   : > { %v2384_v45 = vpop.f32.mrf.mxu1 }
 0x297   : > { %v912_v46 = vpop.f32.mrf.mxu1 }
 0x298   : > { %v918_v47 = vsel %vm802_vm5, %v912_v46, -inf }
 0x299   : > { %919 = vmax.xlane.f32.xlu1 %v918_v47  ;;  %v2395_v48 = vpop.f32.mrf.mxu1 }
 0x29b   : > { %v915_v49 = vpop.f32.mrf.mxu1 }
 0x29d   : > { %v2396_v50 = vpop.f32.mrf.mxu1 }
 0x2ad   : > { %v805_v51 = vpop.xlane.xlu1 %804 }
 0x2ae   : > { %v806_v52 = vsub.f32 %v796_v41, %v805_v51 }
 0x2b0   : > { %v807_v53 = vmul.f32 1.442695, %v806_v52 }
 0x2b2   : > { %2652 = vpow2.f32 %v807_v53  ;;  %v1189_v53 = vld [vmem:[#allocation13 + $0x4] sm:$0x3] }
 0x2bf   : > { %v2653_v54 = vpop.eup %2652 }
 0x2c0   : > { %v809_v57 = vsel %vm802_vm5, %v2653_v54, 0.0  ;;  %v812_v58 = vpack.c.bf16 %v2653_v54, %v2653_v54  ;;  %v1194_v54 = vsel %vm987_vm6, %v1189_v53, 0 }
 0x2c1   : > { %810 = vadd.xlane.f32.xlu0 %v809_v57 }
 0x2c2   : > { %2388 = vmatmul.mubr.msk.bf16.vlgmr.msra.gmra.mxu0 %vm802_vm5, %v812_v58 }
 0x2c3   : > { %2398 = vmatpush3.bf16.msra.mxu0 %v937_v56  ;;  %2399 = vmatprep.mubr.msk.bf16.mxu0 %vm2955_vm0, %v2954_v0 }
 0x2c4   : > { %2409 = vmatprep.subr.bf16.mxu0 %v2954_v0 }
 0x2d7   : > { %1137 = vrot.lane.b32.xlu0 %v3253_v36, %s2957_s14 }
 0x2db   : > { %1237 = vrot.lane.b32.xlu0 %v3248_v34, %s2958_s2 }
 0x322   : > { %v920_v59 = vpop.xlane.xlu1 %919 }
 0x323   : > { %v921_v60 = vsub.f32 %v912_v46, %v920_v59 }
 0x325   : > { %v922_v61 = vmul.f32 1.442695, %v921_v60 }
 0x327   : > { %2654 = vpow2.f32 %v922_v61 }
 0x334   : > { %v2655_v63 = vpop.eup %2654 }
 0x335   : > { %v924_v1 = vsel %vm802_vm5, %v2655_v63, 0.0  ;;  %v927_v2 = vpack.c.bf16 %v2655_v63, %v2655_v63 }
 0x336   : > { %925 = vadd.xlane.f32.xlu1 %v924_v1 }
 0x337   : > { %2400 = vmatmul.mubr.msk.bf16.vlgmr.msra.gmra.mxu0 %vm802_vm5, %v927_v2 }
 0x338   : > { %2410 = vmatpush3.bf16.msra.mxu0 %v1035_v3  ;;  %2411 = vmatprep.mubr.msk.bf16.mxu0 %vm2955_vm0, %v2954_v0 }
 0x339   : > { %2421 = vmatprep.subr.bf16.mxu0 %v2954_v0 }
 0x347   : > { %1077 = vrot.lane.b32.xlu1 %v3248_v34, %s2957_s14 }
 0x34a   : > { %v811_v7 = vpop.xlane.xlu0 %810 }
 0x34b   : > { %2656 = vrcp.f32 %v811_v7 }
 0x34e   : > { %v1138_v12 = vpop.permute.xlu0 %1137 }
 0x34f   : > { %v1143_v16 = vsel %vm816_vm4, %v1138_v12, 0 }
 0x352   : > { %v1238_v52 = vpop.permute.xlu0 %1237 }
 0x358   : > { %v2657_v8 = vpop.eup %2656 }
 0x382   : > { %v854_v10 = vpop.f32.mrf.mxu0 }
 0x383   : > { %v861_v11 = vmul.f32 %v2657_v8, %v854_v10 }
 0x384   : > { %v2389_v13 = vpop.f32.mrf.mxu0 }
 0x385   : > { %v862_v14 = vpack.c.bf16 %v861_v11, %v861_v11 }
 0x386   : > { %v857_v15 = vpop.f32.mrf.mxu0 }
 0x387   : > { %2412 = vmatmul.mubr.msk.bf16.vlgmr.msra.gmra.mxu0 %vm755_vm3, %v862_v14 }
 0x388   : > { %2422 = vmatpush3.bf16.msra.mxu0 %v1143_v16  ;;  %v2390_v17 = vpop.f32.mrf.mxu0  ;;  %2423 = vmatprep.mubr.msk.bf16.mxu0 %vm2955_vm0, %v2954_v0 }
 0x389   : > { %2433 = vmatprep.subr.bf16.mxu0 %v2954_v0 }
 0x3bf   : > { %v926_v18 = vpop.xlane.xlu1 %925 }
 0x3c0   : > { %2658 = vrcp.f32 %v926_v18 }
 0x3c3   : > { %v1078_v27 = vpop.permute.xlu1 %1077 }
 0x3cd   : > { %v2659_v19 = vpop.eup %2658 }
 0x3f7   : > { %v973_v20 = vpop.f32.mrf.mxu0 }
 0x3f8   : > { %v980_v21 = vmul.f32 %v2659_v19, %v973_v20 }
 0x3f9   : > { %v2401_v22 = vpop.f32.mrf.mxu0 }
 0x3fa   : > { %v981_v23 = vpack.c.bf16 %v980_v21, %v980_v21 }
 0x3fb   : > { %v976_v24 = vpop.f32.mrf.mxu0 }
 0x3fc   : > { %2406 = vmatmul.mubr.msk.bf16.vlgmr.msra.gmra.mxu1 %vm755_vm3, %v981_v23  ;;  %v1349_v23 = vld [vmem:[#allocation13 + $0x6] sm:$0x3] }
 0x3fd   : > { %2416 = vmatpush3.bf16.xpose.msra.mxu1 %v1085_v25  ;;  %v2402_v26 = vpop.f32.mrf.mxu0  ;;  %2417 = vmatprep.mubr.msk.bf16.mxu1 %vm2955_vm0, %v2954_v0  ;;  %v1354_v24 = vsel %vm987_vm6, %v1349_v23, 0 }
 0x3fe   : > { %2427 = vmatprep.subr.bf16.mxu1 %v2954_v0 }
 0x404   : > { %2418 = vmatmul.mubr.msk.bf16.vlgmr.msra.gmra.mxu1 %vm755_vm3, %v1078_v27 }
 0x405   : > { %2429 = vmatprep.mubr.msk.bf16.mxu1 %vm2955_vm0, %v2954_v0  ;;  %2428 = vmatpush3.bf16.msra.mxu1 %v1194_v54 }
 0x406   : > { %2439 = vmatprep.subr.bf16.mxu1 %v2954_v0 }
 0x447   : > { %v3304_v28 = vpop.f32.mrf.mxu0 }
 0x449   : > { %v2413_v29 = vpop.f32.mrf.mxu0 }
 0x44b   : > { %v1074_v30 = vpop.f32.mrf.mxu0 }
 0x44d   : > { %v2414_v31 = vpop.f32.mrf.mxu0 }
 0x4bc   : > { %v3306_v33 = vpop.f32.mrf.mxu1 }
 0x4bd   : > { %v1072_v17 = vadd.f32 %v3304_v28, %v3306_v33 }
 0x4be   : > { %v2407_v35 = vpop.f32.mrf.mxu1 }
 0x4c0   : > { %v1028_v37 = vpop.f32.mrf.mxu1 }
 0x4c2   : > { %v2408_v38 = vpop.f32.mrf.mxu1 }
 0x4c4   : > { %v1121_v39 = vpop.f32.mrf.mxu1 }
 0x4c5   : > { %v1127_v40 = vsel %vm802_vm5, %v1121_v39, -inf }
 0x4c6   : > { %1128 = vmax.xlane.f32.xlu1 %v1127_v40  ;;  %v2419_v41 = vpop.f32.mrf.mxu1 }
 0x4c8   : > { %v1124_v42 = vpop.f32.mrf.mxu1 }
 0x4ca   : > { %v2420_v43 = vpop.f32.mrf.mxu1 }
 0x4d7   : > { %1239 = vrot.lane.b32.xlu1 %v3246_v32, %s2958_s2 }
 0x54f   : > { %v1129_v44 = vpop.xlane.xlu1 %1128 }
 0x550   : > { %v1130_v45 = vsub.f32 %v1121_v39, %v1129_v44 }
 0x552   : > { %v1131_v46 = vmul.f32 1.442695, %v1130_v45 }
 0x553   : > { %v1240_v48 = vpop.permute.xlu1 %1239 }
 0x554   : > { %2660 = vpow2.f32 %v1131_v46  ;;  %v1245_v51 = vsel %vm755_vm3, %v1240_v48, 0 }
 0x561   : > { %v2661_v47 = vpop.eup %2660 }
 0x562   : > { %v1133_v49 = vsel %vm802_vm5, %v2661_v47, 0.0  ;;  %v1136_v50 = vpack.c.bf16 %v2661_v47, %v2661_v47 }
 0x563   : > { %1134 = vadd.xlane.f32.xlu0 %v1133_v49 }
 0x564   : > { %2424 = vmatmul.mubr.msk.bf16.vlgmr.msra.gmra.mxu0 %vm802_vm5, %v1136_v50 }
 0x565   : > { %2434 = vmatpush3.bf16.xpose.msra.mxu0 %v1245_v51  ;;  %2435 = vmatprep.mubr.msk.bf16.mxu0 %vm2955_vm0, %v2954_v0 }
 0x566   : > { %2445 = vmatprep.subr.bf16.mxu0 %v2954_v0 }
 0x56c   : > { %2436 = vmatmul.mubr.msk.bf16.vlgmr.msra.gmra.mxu0 %vm755_vm3, %v1238_v52 }
 0x56d   : > { %2447 = vmatprep.mubr.msk.bf16.mxu0 %vm2955_vm0, %v2954_v0  ;;  %2446 = vmatpush3.bf16.msra.mxu0 %v1354_v24 }
 0x56e   : > { %2457 = vmatprep.subr.bf16.mxu0 %v2954_v0 }
 0x579   : > { %1297 = vrot.lane.b32.xlu0 %v3253_v36, %s2958_s2  ;;  %s3528_s2 = sld [smem:[#allocation31_spill]] }
 0x57d   : > { %1397 = vrot.lane.b32.xlu0 %v3248_v34, %s2959_s4 }
 0x5ec   : > { %v1135_v55 = vpop.xlane.xlu0 %1134 }
 0x5ed   : > { %2662 = vrcp.f32 %v1135_v55 }
 0x5f0   : > { %v1298_v59 = vpop.permute.xlu0 %1297 }
 0x5f1   : > { %v1303_v63 = vsel %vm816_vm4, %v1298_v59, 0 }
 0x5f4   : > { %v1398_v16 = vpop.permute.xlu0 %1397 }
 0x5fa   : > { %v2663_v56 = vpop.eup %2662 }
 0x624   : > { %v1179_v57 = vpop.f32.mrf.mxu0 }
 0x625   : > { %v1186_v58 = vmul.f32 %v2663_v56, %v1179_v57  ;;  %v1509_v57 = vld [vmem:[#allocation13 + $0x8] sm:$0x3] }
 0x626   : > { %v2425_v60 = vpop.f32.mrf.mxu0 }
 0x627   : > { %v1187_v61 = vpack.c.bf16 %v1186_v58, %v1186_v58  ;;  %v1514_v58 = vsel %vm987_vm6, %v1509_v57, 0 }
 0x628   : > { %v1182_v62 = vpop.f32.mrf.mxu0 }
 0x629   : > { %2430 = vmatmul.mubr.msk.bf16.vlgmr.msra.gmra.mxu1 %vm755_vm3, %v1187_v61 }
 0x62a   : > { %2440 = vmatpush3.bf16.msra.mxu1 %v1303_v63  ;;  %v2426_v1 = vpop.f32.mrf.mxu0  ;;  %2441 = vmatprep.mubr.msk.bf16.mxu1 %vm2955_vm0, %v2954_v0 }
 0x62b   : > { %2451 = vmatprep.subr.bf16.mxu1 %v2954_v0 }
 0x62c   : > { %v1281_v2 = vpop.f32.mrf.mxu0 }
 0x62d   : > { %v1287_v3 = vsel %vm802_vm5, %v1281_v2, -inf }
 0x62e   : > { %1288 = vmax.xlane.f32.xlu1 %v1287_v3  ;;  %v2437_v4 = vpop.f32.mrf.mxu0 }
 0x630   : > { %v1284_v5 = vpop.f32.mrf.mxu0 }
 0x632   : > { %v2438_v6 = vpop.f32.mrf.mxu0 }
 0x63f   : > { %1399 = vrot.lane.b32.xlu1 %v3246_v32, %s2959_s4 }
 0x6b7   : > { %v1289_v7 = vpop.xlane.xlu1 %1288 }
 0x6b8   : > { %v1290_v8 = vsub.f32 %v1281_v2, %v1289_v7 }
 0x6ba   : > { %v1291_v10 = vmul.f32 1.442695, %v1290_v8 }
 0x6bb   : > { %v1400_v12 = vpop.permute.xlu1 %1399 }
 0x6bc   : > { %2664 = vpow2.f32 %v1291_v10  ;;  %v1405_v15 = vsel %vm755_vm3, %v1400_v12, 0 }
 0x6c9   : > { %v2665_v11 = vpop.eup %2664 }
 0x6ca   : > { %v1293_v13 = vsel %vm802_vm5, %v2665_v11, 0.0  ;;  %v1296_v14 = vpack.c.bf16 %v2665_v11, %v2665_v11 }
 0x6cb   : > { %1294 = vadd.xlane.f32.xlu0 %v1293_v13 }
 0x6cc   : > { %2442 = vmatmul.mubr.msk.bf16.vlgmr.msra.gmra.mxu1 %vm802_vm5, %v1296_v14 }
 0x6cd   : > { %2452 = vmatpush3.bf16.xpose.msra.mxu1 %v1405_v15  ;;  %2453 = vmatprep.mubr.msk.bf16.mxu1 %vm2955_vm0, %v2954_v0 }
 0x6ce   : > { %2463 = vmatprep.subr.bf16.mxu1 %v2954_v0 }
 0x6d4   : > { %2454 = vmatmul.mubr.msk.bf16.vlgmr.msra.gmra.mxu1 %vm755_vm3, %v1398_v16 }
 0x6d5   : > { %2465 = vmatprep.mubr.msk.bf16.mxu1 %vm2955_vm0, %v2954_v0  ;;  %2464 = vmatpush3.bf16.msra.mxu1 %v1514_v58  ;;  %v1829_v58 = vld [vmem:[#allocation13 + $0xc] sm:$0x3] }
 0x6d6   : > { %2475 = vmatprep.subr.bf16.mxu1 %v2954_v0 }
 0x6e1   : > { %1457 = vrot.lane.b32.xlu0 %v3253_v36, %s2959_s4  ;;  %s2090_s4 = scalar_lea.hbm %s3528_s2, %s2295_s12 }
 0x6e5   : > { %1557 = vrot.lane.b32.xlu0 %v3248_v34, %s2960_s8 }
 0x6e9   : > { %v1230_v18 = vpop.f32.mrf.mxu1 }
 0x6ea   : > { %v1236_v19 = vadd.f32 %v1230_v18, %v1072_v17 }
 0x6eb   : > { %v2431_v20 = vpop.f32.mrf.mxu1 }
 0x6ed   : > { %v1233_v21 = vpop.f32.mrf.mxu1 }
 0x6ef   : > { %v2432_v22 = vpop.f32.mrf.mxu1 }
 0x754   : > { %v1295_v25 = vpop.xlane.xlu0 %1294 }
 0x755   : > { %2666 = vrcp.f32 %v1295_v25 }
 0x758   : > { %v1458_v30 = vpop.permute.xlu0 %1457 }
 0x759   : > { %v1463_v33 = vsel %vm816_vm4, %v1458_v30, 0 }
 0x75c   : > { %v1558_v51 = vpop.permute.xlu0 %1557 }
 0x762   : > { %v2667_v26 = vpop.eup %2666 }
 0x78c   : > { %v1339_v27 = vpop.f32.mrf.mxu1 }
 0x78d   : > { %v1346_v29 = vmul.f32 %v2667_v26, %v1339_v27  ;;  %v1669_v26 = vld [vmem:[#allocation13 + $0xa] sm:$0x3] }
 0x78e   : > { %v2443_v31 = vpop.f32.mrf.mxu1  ;;  %v1674_v27 = vsel %vm987_vm6, %v1669_v26, 0 }
 0x78f   : > { %v1347_v35 = vpack.c.bf16 %v1346_v29, %v1346_v29 }
 0x790   : > { %v1342_v28 = vpop.f32.mrf.mxu1 }
 0x791   : > { %2448 = vmatmul.mubr.msk.bf16.vlgmr.msra.gmra.mxu0 %vm755_vm3, %v1347_v35 }
 0x792   : > { %2458 = vmatpush3.bf16.msra.mxu0 %v1463_v33  ;;  %v2444_v37 = vpop.f32.mrf.mxu1  ;;  %2459 = vmatprep.mubr.msk.bf16.mxu0 %vm2955_vm0, %v2954_v0 }
 0x793   : > { %2469 = vmatprep.subr.bf16.mxu0 %v2954_v0 }
 0x794   : > { %v1441_v38 = vpop.f32.mrf.mxu1 }
 0x795   : > { %v1447_v39 = vsel %vm802_vm5, %v1441_v38, -inf }
 0x796   : > { %1448 = vmax.xlane.f32.xlu1 %v1447_v39  ;;  %v2455_v40 = vpop.f32.mrf.mxu1 }
 0x798   : > { %v1444_v41 = vpop.f32.mrf.mxu1 }
 0x79a   : > { %v2456_v42 = vpop.f32.mrf.mxu1 }
 0x7a7   : > { %1559 = vrot.lane.b32.xlu1 %v3246_v32, %s2960_s8 }
 0x81f   : > { %v1449_v43 = vpop.xlane.xlu1 %1448 }
 0x820   : > { %v1450_v44 = vsub.f32 %v1441_v38, %v1449_v43 }
 0x822   : > { %v1451_v45 = vmul.f32 1.442695, %v1450_v44 }
 0x823   : > { %v1560_v47 = vpop.permute.xlu1 %1559 }
 0x824   : > { %2668 = vpow2.f32 %v1451_v45  ;;  %v1565_v50 = vsel %vm755_vm3, %v1560_v47, 0 }
 0x831   : > { %v2669_v46 = vpop.eup %2668 }
 0x832   : > { %v1453_v48 = vsel %vm802_vm5, %v2669_v46, 0.0  ;;  %v1456_v49 = vpack.c.bf16 %v2669_v46, %v2669_v46 }
 0x833   : > { %1454 = vadd.xlane.f32.xlu0 %v1453_v48 }
 0x834   : > { %2460 = vmatmul.mubr.msk.bf16.vlgmr.msra.gmra.mxu0 %vm802_vm5, %v1456_v49 }
 0x835   : > { %2470 = vmatpush3.bf16.xpose.msra.mxu0 %v1565_v50  ;;  %2471 = vmatprep.mubr.msk.bf16.mxu0 %vm2955_vm0, %v2954_v0 }
 0x836   : > { %2481 = vmatprep.subr.bf16.mxu0 %v2954_v0 }
 0x83c   : > { %2472 = vmatmul.mubr.msk.bf16.vlgmr.msra.gmra.mxu0 %vm755_vm3, %v1558_v51 }
 0x83d   : > { %2483 = vmatprep.mubr.msk.bf16.mxu0 %vm2955_vm0, %v2954_v0  ;;  %2482 = vmatpush3.bf16.msra.mxu0 %v1674_v27 }
 0x83e   : > { %2493 = vmatprep.subr.bf16.mxu0 %v2954_v0 }
 0x849   : > { %1617 = vrot.lane.b32.xlu0 %v3253_v36, %s2960_s8  ;;  %s2078_s8 = scalar_lea.sflag [#allocation6], %s3180_s6 }
 0x84d   : > { %1717 = vrot.lane.b32.xlu0 %v3248_v34, %s2961_s0 }
 0x851   : > { %v1390_v52 = vpop.f32.mrf.mxu0 }
 0x852   : > { %v1396_v53 = vadd.f32 %v1390_v52, %v1236_v19 }
 0x853   : > { %v2449_v54 = vpop.f32.mrf.mxu0 }
 0x855   : > { %v1393_v55 = vpop.f32.mrf.mxu0 }
 0x857   : > { %v2450_v56 = vpop.f32.mrf.mxu0 }
 0x8bc   : > { %v1455_v59 = vpop.xlane.xlu0 %1454 }
 0x8bd   : > { %2670 = vrcp.f32 %v1455_v59  ;;  %v1834_v59 = vsel %vm987_vm6, %v1829_v58, 0 }
 0x8c0   : > { %v1618_v63 = vpop.permute.xlu0 %1617 }
 0x8c1   : > { %v1623_v4 = vsel %vm816_vm4, %v1618_v63, 0 }
 0x8c4   : > { %v1718_v20 = vpop.permute.xlu0 %1717 }
 0x8ca   : > { %v2671_v60 = vpop.eup %2670 }
 0x8f4   : > { %v1499_v61 = vpop.f32.mrf.mxu0 }
 0x8f5   : > { %v1506_v62 = vmul.f32 %v2671_v60, %v1499_v61 }
 0x8f6   : > { %v2461_v1 = vpop.f32.mrf.mxu0 }
 0x8f7   : > { %v1507_v2 = vpack.c.bf16 %v1506_v62, %v1506_v62 }
 0x8f8   : > { %v1502_v3 = vpop.f32.mrf.mxu0 }
 0x8f9   : > { %2466 = vmatmul.mubr.msk.bf16.vlgmr.msra.gmra.mxu1 %vm755_vm3, %v1507_v2 }
 0x8fa   : > { %2476 = vmatpush3.bf16.msra.mxu1 %v1623_v4  ;;  %v2462_v5 = vpop.f32.mrf.mxu0  ;;  %2477 = vmatprep.mubr.msk.bf16.mxu1 %vm2955_vm0, %v2954_v0 }
 0x8fb   : > { %2487 = vmatprep.subr.bf16.mxu1 %v2954_v0 }
 0x8fc   : > { %v1601_v6 = vpop.f32.mrf.mxu0 }
 0x8fd   : > { %v1607_v7 = vsel %vm802_vm5, %v1601_v6, -inf }
 0x8fe   : > { %1608 = vmax.xlane.f32.xlu1 %v1607_v7  ;;  %v2473_v8 = vpop.f32.mrf.mxu0 }
 0x900   : > { %v1604_v10 = vpop.f32.mrf.mxu0 }
 0x902   : > { %v2474_v11 = vpop.f32.mrf.mxu0 }
 0x90f   : > { %1719 = vrot.lane.b32.xlu1 %v3246_v32, %s2961_s0 }
 0x987   : > { %v1609_v12 = vpop.xlane.xlu1 %1608 }
 0x988   : > { %v1610_v13 = vsub.f32 %v1601_v6, %v1609_v12 }
 0x98a   : > { %v1611_v14 = vmul.f32 1.442695, %v1610_v13 }
 0x98b   : > { %v1720_v16 = vpop.permute.xlu1 %1719 }
 0x98c   : > { %2672 = vpow2.f32 %v1611_v14  ;;  %v1725_v19 = vsel %vm755_vm3, %v1720_v16, 0 }
 0x999   : > { %v2673_v15 = vpop.eup %2672 }
 0x99a   : > { %v1613_v17 = vsel %vm802_vm5, %v2673_v15, 0.0  ;;  %v1616_v18 = vpack.c.bf16 %v2673_v15, %v2673_v15 }
 0x99b   : > { %1614 = vadd.xlane.f32.xlu1 %v1613_v17 }
 0x99c   : > { %2478 = vmatmul.mubr.msk.bf16.vlgmr.msra.gmra.mxu1 %vm802_vm5, %v1616_v18  ;;  %v1989_v18 = vld [vmem:[#allocation13 + $0xe] sm:$0x3] }
 0x99d   : > { %2488 = vmatpush3.bf16.xpose.msra.mxu1 %v1725_v19  ;;  %2489 = vmatprep.mubr.msk.bf16.mxu1 %vm2955_vm0, %v2954_v0 }
 0x99e   : > { %2499 = vmatprep.subr.bf16.mxu1 %v2954_v0 }
 0x9a4   : > { %2490 = vmatmul.mubr.msk.bf16.vlgmr.msra.gmra.mxu1 %vm755_vm3, %v1718_v20 }
 0x9a5   : > { %2501 = vmatprep.mubr.msk.bf16.mxu1 %vm2955_vm0, %v2954_v0  ;;  %2500 = vmatpush3.bf16.msra.mxu1 %v1834_v59 }
 0x9a6   : > { %2511 = vmatprep.subr.bf16.mxu1 %v2954_v0 }
 0x9ac   : > { %1879 = vrot.lane.b32.xlu1 %v3246_v32, %s2962_s29 }
 0x9b0   : > { %1877 = vrot.lane.b32.xlu1 %v3248_v34, %s2962_s29 }
 0x9b9   : > { %v1550_v21 = vpop.f32.mrf.mxu1 }
 0x9ba   : > { %v1556_v22 = vadd.f32 %v1550_v21, %v1396_v53 }
 0x9bb   : > { %v2467_v23 = vpop.f32.mrf.mxu1 }
 0x9bd   : > { %v1553_v24 = vpop.f32.mrf.mxu1 }
 0x9bf   : > { %v2468_v25 = vpop.f32.mrf.mxu1 }
 0xa24   : > { %v1615_v29 = vpop.xlane.xlu1 %1614 }
 0xa25   : > { %2674 = vrcp.f32 %v1615_v29 }
 0xa28   : > { %v1880_v48 = vpop.permute.xlu1 %1879 }
 0xa29   : > { %v1885_v51 = vsel %vm755_vm3, %v1880_v48, 0 }
 0xa2c   : > { %v1878_v52 = vpop.permute.xlu1 %1877 }
 0xa32   : > { %v2675_v30 = vpop.eup %2674 }
 0xa5c   : > { %v1659_v31 = vpop.f32.mrf.mxu1 }
 0xa5d   : > { %v1666_v35 = vmul.f32 %v2675_v30, %v1659_v31 }
 0xa5e   : > { %v2479_v32 = vpop.f32.mrf.mxu1 }
 0xa5f   : > { %v1667_v28 = vpack.c.bf16 %v1666_v35, %v1666_v35 }
 0xa60   : > { %v1662_v33 = vpop.f32.mrf.mxu1 }
 0xa61   : > { %2484 = vmatmul.mubr.msk.bf16.vlgmr.msra.gmra.mxu0 %vm755_vm3, %v1667_v28  ;;  %v2291_v28 = vld [vmem:[%s3490_s9] ss:$0 sm:$0xff] }
 0xa62   : > { %v2480_v34 = vpop.f32.mrf.mxu1  ;;  %2495 = vmatprep.mubr.msk.bf16.mxu0 %vm2955_vm0, %v2954_v0 }
 0xa64   : > { %v1761_v37 = vpop.f32.mrf.mxu1 }
 0xa65   : > { %v1767_v38 = vsel %vm802_vm5, %v1761_v37, -inf }
 0xa66   : > { %1768 = vmax.xlane.f32.xlu0 %v1767_v38  ;;  %v2491_v39 = vpop.f32.mrf.mxu1 }
 0xa68   : > { %v1764_v40 = vpop.f32.mrf.mxu1 }
 0xa6a   : > { %v2492_v41 = vpop.f32.mrf.mxu1 }
 0xa7c   : > { %1777 = vrot.lane.b32.xlu0 %v3253_v36, %s2961_s0  ;;  %s2846_s0 = scalar_lea.vmem %s2093_s20, 128 }
 0xa7d   : > { %p2847_p11 = scmp.ne.s32.totalorder %s2093_s20, %s2846_s0 }
 0xa7f   : > { %p2848_p5 = pnand %p2847_p11, %p3135_p10 }
 0xa81   : > { %p2849_p4 = pneg %p2848_p5 }
 0xaef   : > { %v1769_v42 = vpop.xlane.xlu0 %1768 }
 0xaf0   : > { %v1770_v43 = vsub.f32 %v1761_v37, %v1769_v42 }
 0xaf2   : > { %v1771_v44 = vmul.f32 1.442695, %v1770_v43 }
 0xaf3   : > { %v1778_v45 = vpop.permute.xlu0 %1777 }
 0xaf4   : > { %2676 = vpow2.f32 %v1771_v44  ;;  %v1783_v46 = vsel %vm816_vm4, %v1778_v45, 0 }
 0xaf5   : > { %2494 = vmatpush3.bf16.msra.mxu0 %v1783_v46 }
 0xaf6   : > { %2505 = vmatprep.subr.bf16.mxu0 %v2954_v0 }
 0xb01   : > { %v2677_v47 = vpop.eup %2676 }
 0xb02   : > { %v1773_v49 = vsel %vm802_vm5, %v2677_v47, 0.0  ;;  %v1776_v50 = vpack.c.bf16 %v2677_v47, %v2677_v47 }
 0xb03   : > { %1774 = vadd.xlane.f32.xlu0 %v1773_v49 }
 0xb04   : > { %2496 = vmatmul.mubr.msk.bf16.vlgmr.msra.gmra.mxu0 %vm802_vm5, %v1776_v50  ;;  %v2292_v50 = vld [vmem:[%s3491_s10] ss:$0 sm:$0xff] }
 0xb05   : > { %2506 = vmatpush3.bf16.xpose.msra.mxu0 %v1885_v51  ;;  %2507 = vmatprep.mubr.msk.bf16.mxu0 %vm2955_vm0, %v2954_v0 }
 0xb06   : > { %2517 = vmatprep.subr.bf16.mxu0 %v2954_v0 }
 0xb0c   : > { %2508 = vmatmul.mubr.msk.bf16.vlgmr.msra.gmra.mxu0 %vm755_vm3, %v1878_v52  ;;  %v2293_v52 = vld [vmem:[%s3492_s11] ss:$0 sm:$0xff] }
 0xb0d   : > { %2519 = vmatprep.mubr.msk.bf16.mxu0 %vm2955_vm0, %v2954_v0 }
 0xb19   : > { %1937 = vrot.lane.b32.xlu0 %v3253_v36, %s2962_s29  ;;  %s2963_s29 = smov [#allocation15]  }
 0xb1a   : > { %s2850_s21 = sshll.u32 %s2963_s29, 4  ;;  %s2851_s21 = int_to_ptr.vmem [resolvable:$false] %s2850_s21 }
 0xb1b   : > { %s2852_s24 = scalar_lea.vmem %s2851_s21, 256  ;;  %p2853_p6 = scmp.lt.s32.totalorder %s2093_s20, %s2851_s21 }
 0xb1c   : > { %p2854_p8 = scmp.lt.s32.totalorder %s2852_s24, %s2846_s0 }
 0xb1e   : > { %p2855_p9 = por %p2854_p8, %p2853_p6 }
 0xb20   : > { %p2856_p3 = pnand %p2855_p9, %p2849_p4 }
 0xb21   : > { %v1710_v53 = vpop.f32.mrf.mxu0 }
 0xb22   : > { %v1716_v54 = vadd.f32 %v1710_v53, %v1556_v22 }
 0xb23   : > { %v2485_v55 = vpop.f32.mrf.mxu0 }
 0xb25   : > { %v1713_v56 = vpop.f32.mrf.mxu0 }
 0xb27   : > { %v2486_v57 = vpop.f32.mrf.mxu0 }
 0xb8c   : > { %v1775_v60 = vpop.xlane.xlu0 %1774 }
 0xb8d   : > { %2678 = vrcp.f32 %v1775_v60 }
 0xb90   : > { %v1938_v1 = vpop.permute.xlu0 %1937 }
 0xb91   : > { %v1943_v4 = vsel %vm816_vm4, %v1938_v1, 0 }
 0xb9a   : > { %v2679_v61 = vpop.eup %2678 }
 0xbc4   : > { %v1819_v62 = vpop.f32.mrf.mxu0 }
 0xbc5   : > { %v1826_v63 = vmul.f32 %v2679_v61, %v1819_v62 }
 0xbc6   : > { %v2497_v2 = vpop.f32.mrf.mxu0 }
 0xbc7   : > { %v1827_v3 = vpack.c.bf16 %v1826_v63, %v1826_v63 }
 0xbc8   : > { %v1822_v36 = vpop.f32.mrf.mxu0 }
 0xbc9   : > { %2502 = vmatmul.mubr.msk.bf16.vlgmr.msra.gmra.mxu1 %vm755_vm3, %v1827_v3 }
 0xbca   : > { %2512 = vmatpush3.bf16.msra.mxu1 %v1943_v4  ;;  %v2498_v5 = vpop.f32.mrf.mxu0  ;;  %2513 = vmatprep.mubr.msk.bf16.mxu1 %vm2955_vm0, %v2954_v0  ;;  %v1994_v0 = vsel %vm987_vm6, %v1989_v18, 0 }
 0xbcb   : > { %2518 = vmatpush3.bf16.msra.mxu0 %v1994_v0 }
 0xbcc   : > { %v1921_v6 = vpop.f32.mrf.mxu0 }
 0xbcd   : > { %v1927_v7 = vsel %vm802_vm5, %v1921_v6, -inf }
 0xbce   : > { %1928 = vmax.xlane.f32.xlu1 %v1927_v7  ;;  %v2509_v8 = vpop.f32.mrf.mxu0 }
 0xbd0   : > { %v1924_v10 = vpop.f32.mrf.mxu0 }
 0xbd2   : > { %v2510_v11 = vpop.f32.mrf.mxu0 }
 0xc57   : > { %v1929_v12 = vpop.xlane.xlu1 %1928 }
 0xc58   : > { %v1930_v13 = vsub.f32 %v1921_v6, %v1929_v12 }
 0xc5a   : > { %v1931_v14 = vmul.f32 1.442695, %v1930_v13 }
 0xc5c   : > { %2680 = vpow2.f32 %v1931_v14 }
 0xc69   : > { %v2681_v15 = vpop.eup %2680 }
 0xc6a   : > { %v1933_v16 = vsel %vm802_vm5, %v2681_v15, 0.0  ;;  %v1936_v17 = vpack.c.bf16 %v2681_v15, %v2681_v15 }
 0xc6b   : > { %1934 = vadd.xlane.f32.xlu1 %v1933_v16 }
 0xc6c   : > { %2514 = vmatmul.mubr.msk.bf16.vlgmr.msra.gmra.mxu1 %vm802_vm5, %v1936_v17 }
 0xc89   : > { %v1870_v19 = vpop.f32.mrf.mxu1 }
 0xc8a   : > { %v1876_v20 = vadd.f32 %v1870_v19, %v1716_v54 }
 0xc8b   : > { %v2503_v21 = vpop.f32.mrf.mxu1 }
 0xc8d   : > { %v1873_v22 = vpop.f32.mrf.mxu1 }
 0xc8f   : > { %v2504_v23 = vpop.f32.mrf.mxu1 }
 0xcf4   : > { %v1935_v24 = vpop.xlane.xlu1 %1934 }
 0xcf5   : > { %2682 = vrcp.f32 %v1935_v24 }
 0xd02   : > { %v2683_v25 = vpop.eup %2682 }
 0xd2c   : > { %v1979_v26 = vpop.f32.mrf.mxu1 }
 0xd2d   : > { %v1986_v27 = vmul.f32 %v2683_v25, %v1979_v26 }
 0xd2e   : > { %v2515_v29 = vpop.f32.mrf.mxu1 }
 0xd2f   : > { %v1987_v30 = vpack.c.bf16 %v1986_v27, %v1986_v27 }
 0xd30   : > { %v1982_v31 = vpop.f32.mrf.mxu1 }
 0xd31   : > { %2520 = vmatmul.mubr.msk.bf16.vlgmr.msra.gmra.mxu0 %vm755_vm3, %v1987_v30 }
 0xd32   : > { %v2516_v35 = vpop.f32.mrf.mxu1 }
 0xdf1   : > { %v2030_v32 = vpop.f32.mrf.mxu0 }
 0xdf2   : > { %v2036_v33 = vadd.f32 %v2030_v32, %v1876_v20 }
 0xdf3   : > { %v2521_v34 = vpop.f32.mrf.mxu0 }
 0xdf4   : > { %v2044_v37 = vadd.f32 %v2291_v28, %v2036_v33 }
 0xdf5   : > { %v2033_v38 = vpop.f32.mrf.mxu0 }
 0xdf6   : > { %v2045_v39 = vadd.f32 %v2044_v37, %v3223_v9 }
 0xdf7   : > { %v2522_v40 = vpop.f32.mrf.mxu0 }
 0xdf8   : > { %v2046_v41 = vsel %vm571_vm1, %v2045_v39, 0.0 }
 0xdf9   : > { %2047 = vadd.xlane.f32.xlu1 %v2046_v41 }
 0xe82   : > { %v2048_v42 = vpop.xlane.xlu1 %2047 }
 0xe83   : > { %v2050_v43 = vmul.f32 0.03125, %v2048_v42 }
 0xe85   : > { %v2051_v44 = vsub.f32 %v2045_v39, %v2050_v43 }
 0xe87   : > { %v2052_v45 = vmul.f32 %v2051_v44, %v2051_v44 }
 0xe89   : > { %v2053_v46 = vsel %vm571_vm1, %v2052_v45, 0.0 }
 0xe8a   : > { %2054 = vadd.xlane.f32.xlu1 %v2053_v46 }
 0xf13   : > { %v2055_v47 = vpop.xlane.xlu1 %2054 }
 0xf14   : > { %v2056_v48 = vmul.f32 0.03125, %v2055_v47 }
 0xf16   : > { %v2057_v49 = vadd.f32 1e-12, %v2056_v48 }
 0xf18   : > { %2684 = vrsqrt.f32 %v2057_v49 }
 0xf25   : > { %v2685_v9 = vpop.eup %2684 }
 0xf26   : > { %v2059_v51 = vmul.f32 %v2685_v9, %v2051_v44 }
 0xf28   : > { %v2067_v53 = vmul.f32 %v2292_v50, %v2059_v51 }
 0xf2a   : > { %v2075_v54 = vadd.f32 %v2293_v52, %v2067_v53 }
 0xf2c   : > { %2076 = vst.msk [vmem:[%s540_s19] sm:$0xff] %vm571_vm1, %v2075_v54 }
 0xf2d   : > { %2859 = shalt.err (!%p2856_p3)
}
 0xf2e   : > { %s2860_s25 = scalar_lea.hbm %s2090_s4, 128  ;;  %s2864_s18 = scalar_lea.hbm %s3528_s2, 256 }
 0xf2f   : > { %p2861_p7 = scmp.ne.s32.totalorder %s2090_s4, %s2860_s25  ;;  %p2865_p13 = scmp.lt.s32.totalorder %s2090_s4, %s3528_s2 }
 0xf30   : > { %p2866_p2 = scmp.lt.s32.totalorder %s2864_s18, %s2860_s25 }
 0xf31   : > { %p2862_p0 = pnand %p2861_p7, %p3135_p10 }
 0xf32   : > { %p2867_p11 = por %p2866_p2, %p2865_p13 }
 0xf33   : > { %p2863_p12 = pneg %p2862_p0 }
 0xf35   : > { %p2868_p5 = pnand %p2867_p11, %p2863_p12 }
 0xf37   : > { %2871 = shalt.err (!%p2868_p5)
}
 0xf38   : > { %2543 = dma.vmem_to_hbm [thread:$0]  (%p3135_p10), %s2093_s20, 128, %s2090_s4, %s2078_s8  }
 0xf39 PF: > { %s3529_s13 = sld [smem:[#allocation22_spill]]  ;;  %p3530_p4 = scmp.ge.s32.totalorder %s2942_s26, 2 }
 0xf3b   : > { %p2566_p6 = pnand %p3530_p4, %p3142_p1 }
 0xf3d   : > { %p2567_p8 = pneg %p2566_p6 }
 0xf3f   : > { %s2104_s12 = sand.u32 1, %s3529_s13  }
 0xf40   : > { %s2105_s19 = scalar_lea.sflag [#allocation6], %s2104_s12 }
 0xf41   : > { %2917 = dma.done.wait (%p2567_p8), %s2105_s19, 128  }
 0xf42   : > { %2919 = vsyncadd (%p2567_p8), %s2105_s19, 4294967168  ;;  %s33_s26 = sadd.s32 1, %s2942_s26   ;;  %s3531_s30 = sld [smem:[#allocation25_spill]] }
 0xf43   : > { %p30_p9 = scmp.ge.s32.totalorder %s33_s26, 4   ;;  %s3532_s24 = sld [smem:[#allocation23_spill]] }
 0xf44   : > { %s3533_s25 = sld [smem:[#allocation24_spill]]  ;;  %s3534_s21 = smov %s2926_s22 }
 0xf45   : > { %s3535_s22 = smov %s2930_s23  ;;  %32 = sbr.rel (!%p30_p9) target bundleno = 17 (0x11), region = 153 }
 0xf48   : > { %s3536_s23 = smov %s3531_s30 }
 0xf4a   :  { %2110 = vsyncpa [#allocation5], 1 }
 0xf4b   :  { %2112 = vsyncpa [#allocation5 + $0x1], 1 }
 0xf4c   :  { %2113 = vsyncpa [#allocation8], 1 }
 0xf4d   :  { %2115 = vsyncpa [#allocation8 + $0x1], 1 }
 0xf4e   :  { %2116 = vsyncpa [#allocation11], 1 }
 0xf4f   :  { %2117 = vsyncpa [#allocation14], 1 }
 0xf50   :  { %2118 = vsyncpa [#allocation6], 1 }
 0xf51   :  { %2120 = vsyncpa [#allocation6 + $0x1], 1 }

</bundles_post_ra>
